<compile_context>
chip_gen: v5e
topology: v5e:2x2
jax: 0.10.0
libtpu: 0.0.40
codegen_flags: <defaults>
</compile_context>

<pallas_src>
import functools

import jax
import jax.numpy as jnp
from jax.experimental import pallas as pl
from jax.experimental.pallas import tpu as pltpu

NEG_INF = -1e30


# ----------------------------------------------------------------------------
# Kernel 1: fused   out_rows = [elu](GATConv(x)_rows) + x_rows @ W_skip + b_skip
# Grid: destination-row tiles ("parallel"); source axis kept whole per tile.
# ----------------------------------------------------------------------------
def gat_skip_kernel(xr_ref, xall_ref, xt_ref, wg_ref, wrow_ref, asx_ref,
                    bg_ref, bs_ref, mb_ref, out_ref, *, heads, ch, apply_elu):
    F = heads * ch
    x_rows = xr_ref[...]                                   # (TM, Fin) dst rows
    x_all = xall_ref[...]                                  # (N, Fin)  all sources

    # source-node features after the GAT input projection (needed for the
    # weighted aggregation) -- one MXU matmul over all nodes.
    h_all = jnp.dot(x_all, wg_ref[...], preferred_element_type=jnp.float32)    # (N, F)

    # fused row-tile projection: [W_skip | a_dst-coefficients] in one matmul.
    proj = jnp.dot(x_rows, wrow_ref[...], preferred_element_type=jnp.float32)  # (TM, F+H)
    skip_rows = proj[:, :F]                                 # (TM, F)
    alpha_dst = proj[:, F:]                                 # (TM, H)

    # per-head source attention terms, already lane-oriented (H, N): MXU op,
    # no cross-lane reductions or transposes inside the kernel.
    srcrow = jnp.dot(asx_ref[...], xt_ref[...], preferred_element_type=jnp.float32)  # (H, N)

    mb = mb_ref[...]                                        # (TM, N) additive 0 / -1e30
    bg = bg_ref[...]                                        # (1, F)  GAT bias
    bs = bs_ref[...]                                        # (1, F)  skip bias

    for hd in range(heads):                                 # heads is tiny & static
        lo = hd * ch
        e = alpha_dst[:, hd:hd + 1] + srcrow[hd:hd + 1, :]          # (TM, N)
        e = jnp.where(e > 0, e, 0.2 * e) + mb                        # LeakyReLU + mask bias
        m = jnp.max(e, axis=-1, keepdims=True)                       # finite (self loops)
        p = jnp.exp(e - m)                                           # masked -> exact 0
        p = p * pl.reciprocal(jnp.sum(p, axis=-1, keepdims=True), approx=True)
        agg = jnp.dot(p, h_all[:, lo:lo + ch], preferred_element_type=jnp.float32)
        v = agg + bg[:, lo:lo + ch]
        if apply_elu:
            v = jnp.where(v > 0, v, jnp.exp(jnp.minimum(v, 0.0)) - 1.0)
        # write each head straight into its lane slice (no concat / relayout).
        out_ref[:, lo:lo + ch] = v + skip_rows[:, lo:lo + ch] + bs[:, lo:lo + ch]


def gat_skip_layer(x, w_gat, asrc, adst, b_gat, w_skip, b_skip, mask_bias, *,
                   heads, ch, apply_elu, row_tile=None):
    n, fin = x.shape
    F = heads * ch
    tm = row_tile if row_tile is not None else n
    assert n % tm == 0

    # host-side (traced, tiny) precompute: fold the attention vectors through
    # the input projection so all coefficient reductions become MXU matmuls.
    w3 = w_gat.reshape(fin, heads, ch)
    asrc_x = jnp.einsum('fhc,hc->hf', w3, asrc)          # (H, Fin)
    adst_x = jnp.einsum('fhc,hc->fh', w3, adst)          # (Fin, H)
    wrow = jnp.concatenate([w_skip, adst_x], axis=1)     # (Fin, F+H) fused projection
    xt = x.T                                             # (Fin, N) for lane-oriented a_src

    def full(shape):
        return pl.BlockSpec(shape, lambda i: (0,) * len(shape))

    kern = functools.partial(gat_skip_kernel, heads=heads, ch=ch, apply_elu=apply_elu)
    return pl.pallas_call(
        kern,
        out_shape=jax.ShapeDtypeStruct((n, F), jnp.float32),
        grid=(n // tm,),
        in_specs=[
            pl.BlockSpec((tm, fin), lambda i: (i, 0)),    # x, destination-row tile
            full((n, fin)),                               # x, all source rows
            full((fin, n)),                               # x^T
            full((fin, F)),                               # W_gat
            full((fin, F + heads)),                       # [W_skip | adst folded]
            full((heads, fin)),                           # asrc folded into x-space
            full((1, F)),                                 # GAT bias
            full((1, F)),                                 # skip bias
            pl.BlockSpec((tm, n), lambda i: (i, 0)),      # additive mask rows
        ],
        out_specs=pl.BlockSpec((tm, F), lambda i: (i, 0)),
        compiler_params=pltpu.CompilerParams(dimension_semantics=("parallel",)),
    )(x, x, xt, w_gat, wrow, asrc_x,
      b_gat.reshape(1, F), b_skip.reshape(1, F), mask_bias)


# ----------------------------------------------------------------------------
# Kernel 2: edge MLP  Linear -> ReLU -> Linear (concat avoided by splitting W1)
# ----------------------------------------------------------------------------
def edge_mlp_kernel(src_ref, dst_ref, w1s_ref, w1d_ref, b1_ref, w2_ref, b2_ref, out_ref):
    h = (jnp.dot(src_ref[...], w1s_ref[...], preferred_element_type=jnp.float32)
         + jnp.dot(dst_ref[...], w1d_ref[...], preferred_element_type=jnp.float32)
         + b1_ref[...])
    h = jnp.maximum(h, 0.0)
    out_ref[...] = jnp.dot(h, w2_ref[...], preferred_element_type=jnp.float32) + b2_ref[...]


def edge_mlp(src, dst, w1, b1, w2, b2):
    e, f = src.shape
    w1s, w1d = w1[:f], w1[f:]
    spec = pl.BlockSpec(memory_space=pltpu.MemorySpace.VMEM)
    return pl.pallas_call(
        edge_mlp_kernel,
        out_shape=jax.ShapeDtypeStruct((e, 1), jnp.float32),
        in_specs=[spec] * 7,
        out_specs=spec,
    )(src, dst, w1s, w1d, b1.reshape(1, -1), w2, b2.reshape(1, -1))


# ----------------------------------------------------------------------------
# Model wrapper
# ----------------------------------------------------------------------------
def build_mask_bias(edge_index, n):
    # additive softmax bias: 0 where there is an edge j -> i (or self loop),
    # -1e30 elsewhere (exp underflows to exact 0 after the row-max subtraction).
    mb = jnp.full((n, n), NEG_INF, jnp.float32)
    mb = mb.at[edge_index[1], edge_index[0]].set(0.0)
    mb = mb.at[jnp.arange(n), jnp.arange(n)].set(0.0)     # PyG adds self loops
    return mb


def deep_gat_forward(params, x, edge_index, edge_pairs, *, hidden,
                     heads1=2, heads2=2, heads3=1, row_tile=None):
    n = x.shape[0]
    mb = build_mask_bias(edge_index, n)

    x1 = gat_skip_layer(x, params['g1_w'], params['g1_as'], params['g1_ad'],
                        params['g1_b'], params['s1_w'], params['s1_b'], mb,
                        heads=heads1, ch=hidden, apply_elu=True, row_tile=row_tile)
    x2 = gat_skip_layer(x1, params['g2_w'], params['g2_as'], params['g2_ad'],
                        params['g2_b'], params['s2_w'], params['s2_b'], mb,
                        heads=heads2, ch=hidden, apply_elu=True, row_tile=row_tile)
    x3 = gat_skip_layer(x2, params['g3_w'], params['g3_as'], params['g3_ad'],
                        params['g3_b'], params['s3_w'], params['s3_b'], mb,
                        heads=heads3, ch=hidden, apply_elu=False, row_tile=row_tile)

    # data-dependent row gather stays in XLA glue.
    # TODO(synk): for large E, fold the gather into the MLP kernel via
    # PrefetchScalarGridSpec + pl.Element row indexing and a lane-dense output.
    src = x3[edge_pairs[:, 0]]
    dst = x3[edge_pairs[:, 1]]
    scores = edge_mlp(src, dst, params['m1_w'], params['m1_b'],
                      params['m2_w'], params['m2_b'])
    return scores[:, 0], x3


# ----------------------------------------------------------------------------
# Pure-JAX reference (mirrors PyG GATConv semantics) for a correctness check.
# ----------------------------------------------------------------------------
def _gat_ref(x, w, asrc, adst, b, mask, heads, ch):
    h = x @ w
    outs = []
    for hd in range(heads):
        hh = h[:, hd * ch:(hd + 1) * ch]
        a_s = (hh * asrc[hd]).sum(-1)
        a_d = (hh * adst[hd]).sum(-1)
        e = a_d[:, None] + a_s[None, :]
        e = jnp.where(e > 0, e, 0.2 * e)
        e = jnp.where(mask > 0, e, -jnp.inf)
        p = jax.nn.softmax(e, axis=-1)
        outs.append(p @ hh)
    return (outs[0] if heads == 1 else jnp.concatenate(outs, -1)) + b


def deep_gat_reference(params, x, edge_index, edge_pairs, *, hidden):
    n = x.shape[0]
    mask = jnp.zeros((n, n), jnp.float32)
    mask = mask.at[edge_index[1], edge_index[0]].set(1.0)
    mask = mask.at[jnp.arange(n), jnp.arange(n)].set(1.0)
    x1 = jax.nn.elu(_gat_ref(x, params['g1_w'], params['g1_as'], params['g1_ad'],
                             params['g1_b'], mask, 2, hidden)) + x @ params['s1_w'] + params['s1_b']
    x2 = jax.nn.elu(_gat_ref(x1, params['g2_w'], params['g2_as'], params['g2_ad'],
                             params['g2_b'], mask, 2, hidden)) + x1 @ params['s2_w'] + params['s2_b']
    x3 = _gat_ref(x2, params['g3_w'], params['g3_as'], params['g3_ad'],
                  params['g3_b'], mask, 1, hidden) + x2 @ params['s3_w'] + params['s3_b']
    src = x3[edge_pairs[:, 0]]
    dst = x3[edge_pairs[:, 1]]
    ef = jnp.concatenate([src, dst], 1)
    h = jnp.maximum(ef @ params['m1_w'] + params['m1_b'], 0.0)
    return (h @ params['m2_w'] + params['m2_b']).squeeze(-1), x3


# ----------------------------------------------------------------------------
def make_params(key, in_ch, hid, h1, h2, h3):
    ks = jax.random.split(key, 20)
    f = lambda k, shape: (0.1 * jax.random.normal(k, shape)).astype(jnp.float32)
    return {
        # GAT 1
        'g1_w': f(ks[0], (in_ch, h1 * hid)), 'g1_as': f(ks[1], (h1, hid)),
        'g1_ad': f(ks[2], (h1, hid)), 'g1_b': f(ks[3], (h1 * hid,)),
        # GAT 2
        'g2_w': f(ks[4], (h1 * hid, h2 * hid)), 'g2_as': f(ks[5], (h2, hid)),
        'g2_ad': f(ks[6], (h2, hid)), 'g2_b': f(ks[7], (h2 * hid,)),
        # GAT 3
        'g3_w': f(ks[8], (h2 * hid, h3 * hid)), 'g3_as': f(ks[9], (h3, hid)),
        'g3_ad': f(ks[10], (h3, hid)), 'g3_b': f(ks[11], (h3 * hid,)),
        # skips (stored pre-transposed: (in, out))
        's1_w': f(ks[12], (in_ch, h1 * hid)), 's1_b': f(ks[13], (h1 * hid,)),
        's2_w': f(ks[14], (h1 * hid, h2 * hid)), 's2_b': f(ks[15], (h2 * hid,)),
        's3_w': f(ks[16], (h2 * hid, h3 * hid)), 's3_b': f(ks[17], (h3 * hid,)),
        # edge MLP: Linear(2*h3*hid -> hid), ReLU, Linear(hid -> 1)
        'm1_w': f(ks[18], (2 * h3 * hid, hid)), 'm1_b': jnp.zeros((hid,), jnp.float32),
        'm2_w': f(ks[19], (hid, 1)), 'm2_b': jnp.zeros((1,), jnp.float32),
    }


if __name__ == "__main__":
    in_ch, hid = 8, 8
    h1, h2, h3 = 2, 2, 1
    N = 16

    key = jax.random.PRNGKey(0)
    kx, kp = jax.random.split(key)
    params = make_params(kp, in_ch, hid, h1, h2, h3)

    x = jax.random.normal(kx, (N, in_ch), dtype=jnp.float32)

    # deterministic duplicate-free directed edges, no self loops
    src_n = jnp.concatenate([jnp.arange(N), jnp.arange(N)])
    dst_n = jnp.concatenate([(jnp.arange(N) + 1) % N, (jnp.arange(N) + 3) % N])
    edge_index = jnp.stack([src_n, dst_n]).astype(jnp.int32)        # (2, 32)

    edge_pairs = jnp.stack(
        [jnp.arange(0, N, 2), jnp.arange(1, N, 2)], axis=1).astype(jnp.int32)  # (8, 2)

    fwd = jax.jit(functools.partial(
        deep_gat_forward, hidden=hid, heads1=h1, heads2=h2, heads3=h3, row_tile=8))
    scores, x3 = fwd(params, x, edge_index, edge_pairs)
    jax.block_until_ready((scores, x3))

    ref_scores, ref_x3 = deep_gat_reference(params, x, edge_index, edge_pairs, hidden=hid)
    assert scores.shape == (edge_pairs.shape[0],)
    assert x3.shape == (N, h3 * hid)
    # tolerance accounts for pl.reciprocal(approx=True) in the softmax divide
    assert jnp.allclose(scores, ref_scores, atol=3e-3, rtol=3e-3)
    assert jnp.allclose(x3, ref_x3, atol=3e-3, rtol=3e-3)

    print("KERNEL_OK")
</pallas_src>

<mosaic_0001>
module attributes {stable_mosaic.version = 11 : i64} {
  func.func @gat_skip_kernel(%arg0: i32, %arg1: memref<8x8xf32, #tpu.memory_space<vmem>>, %arg2: memref<16x8xf32, #tpu.memory_space<vmem>>, %arg3: memref<8x16xf32, #tpu.memory_space<vmem>>, %arg4: memref<8x16xf32, #tpu.memory_space<vmem>>, %arg5: memref<8x18xf32, #tpu.memory_space<vmem>>, %arg6: memref<2x8xf32, #tpu.memory_space<vmem>>, %arg7: memref<1x16xf32, #tpu.memory_space<vmem>>, %arg8: memref<1x16xf32, #tpu.memory_space<vmem>>, %arg9: memref<8x16xf32, #tpu.memory_space<vmem>>, %arg10: memref<8x16xf32, #tpu.memory_space<vmem>>) attributes {dimension_semantics = [#tpu.dimension_semantics<parallel>], iteration_bounds = array<i64: 2>, scalar_prefetch = 0 : i64, scratch_operands = 0 : i64, tpu.core_type = #tpu.core_type<tc>, window_params = [{transform_indices = @transform_0, window_bounds = array<i64: 8, 8>}, {pipeline_mode = #tpu.pipeline_mode<synchronous>, transform_indices = @transform_1, window_bounds = array<i64: 16, 8>}, {pipeline_mode = #tpu.pipeline_mode<synchronous>, transform_indices = @transform_2, window_bounds = array<i64: 8, 16>}, {pipeline_mode = #tpu.pipeline_mode<synchronous>, transform_indices = @transform_3, window_bounds = array<i64: 8, 16>}, {pipeline_mode = #tpu.pipeline_mode<synchronous>, transform_indices = @transform_4, window_bounds = array<i64: 8, 18>}, {pipeline_mode = #tpu.pipeline_mode<synchronous>, transform_indices = @transform_5, window_bounds = array<i64: 2, 8>}, {pipeline_mode = #tpu.pipeline_mode<synchronous>, transform_indices = @transform_6, window_bounds = array<i64: 1, 16>}, {pipeline_mode = #tpu.pipeline_mode<synchronous>, transform_indices = @transform_7, window_bounds = array<i64: 1, 16>}, {transform_indices = @transform_8, window_bounds = array<i64: 8, 16>}, {transform_indices = @transform_9, window_bounds = array<i64: 8, 16>}]} {
    %c0 = arith.constant 0 : index
    %c0_0 = arith.constant 0 : index
    %0 = vector.load %arg1[%c0, %c0_0] : memref<8x8xf32, #tpu.memory_space<vmem>>, vector<8x8xf32>
    %c0_1 = arith.constant 0 : index
    %c0_2 = arith.constant 0 : index
    %1 = vector.load %arg2[%c0_1, %c0_2] : memref<16x8xf32, #tpu.memory_space<vmem>>, vector<16x8xf32>
    %c0_3 = arith.constant 0 : index
    %c0_4 = arith.constant 0 : index
    %2 = vector.load %arg4[%c0_3, %c0_4] : memref<8x16xf32, #tpu.memory_space<vmem>>, vector<8x16xf32>
    %cst = arith.constant dense<0.000000e+00> : vector<16x16xf32>
    %3 = tpu.matmul %1, %2, %cst {dimension_numbers = #tpu.dot_dimension_numbers<[1], [0], [0], [1], [0, 0, 1, 1], [], []>} : vector<16x8xf32>, vector<8x16xf32>, vector<16x16xf32> -> vector<16x16xf32>
    %c0_5 = arith.constant 0 : index
    %c0_6 = arith.constant 0 : index
    %4 = vector.load %arg5[%c0_5, %c0_6] : memref<8x18xf32, #tpu.memory_space<vmem>>, vector<8x18xf32>
    %cst_7 = arith.constant dense<0.000000e+00> : vector<8x18xf32>
    %5 = tpu.matmul %0, %4, %cst_7 {dimension_numbers = #tpu.dot_dimension_numbers<[1], [0], [0], [1], [0, 0, 1, 1], [], []>} : vector<8x8xf32>, vector<8x18xf32>, vector<8x18xf32> -> vector<8x18xf32>
    %6 = vector.extract_strided_slice %5 {offsets = [0, 0], sizes = [8, 16], strides = [1, 1]} : vector<8x18xf32> to vector<8x16xf32>
    %7 = vector.extract_strided_slice %5 {offsets = [0, 16], sizes = [8, 2], strides = [1, 1]} : vector<8x18xf32> to vector<8x2xf32>
    %c0_8 = arith.constant 0 : index
    %c0_9 = arith.constant 0 : index
    %8 = vector.load %arg6[%c0_8, %c0_9] : memref<2x8xf32, #tpu.memory_space<vmem>>, vector<2x8xf32>
    %c0_10 = arith.constant 0 : index
    %c0_11 = arith.constant 0 : index
    %9 = vector.load %arg3[%c0_10, %c0_11] : memref<8x16xf32, #tpu.memory_space<vmem>>, vector<8x16xf32>
    %cst_12 = arith.constant dense<0.000000e+00> : vector<2x16xf32>
    %10 = tpu.matmul %8, %9, %cst_12 {dimension_numbers = #tpu.dot_dimension_numbers<[1], [0], [0], [1], [0, 0, 1, 1], [], []>} : vector<2x8xf32>, vector<8x16xf32>, vector<2x16xf32> -> vector<2x16xf32>
    %c0_13 = arith.constant 0 : index
    %c0_14 = arith.constant 0 : index
    %11 = vector.load %arg9[%c0_13, %c0_14] : memref<8x16xf32, #tpu.memory_space<vmem>>, vector<8x16xf32>
    %c0_15 = arith.constant 0 : index
    %c0_16 = arith.constant 0 : index
    %12 = vector.load %arg7[%c0_15, %c0_16] : memref<1x16xf32, #tpu.memory_space<vmem>>, vector<1x16xf32>
    %c0_17 = arith.constant 0 : index
    %c0_18 = arith.constant 0 : index
    %13 = vector.load %arg8[%c0_17, %c0_18] : memref<1x16xf32, #tpu.memory_space<vmem>>, vector<1x16xf32>
    %14 = vector.extract_strided_slice %7 {offsets = [0, 0], sizes = [8, 1], strides = [1, 1]} : vector<8x2xf32> to vector<8x1xf32>
    %15 = vector.extract_strided_slice %10 {offsets = [0, 0], sizes = [1, 16], strides = [1, 1]} : vector<2x16xf32> to vector<1x16xf32>
    %16 = vector.broadcast %14 : vector<8x1xf32> to vector<8x16xf32>
    %17 = vector.broadcast %15 : vector<1x16xf32> to vector<8x16xf32>
    %18 = arith.addf %16, %17 : vector<8x16xf32>
    %cst_19 = arith.constant 0.000000e+00 : f32
    %19 = vector.broadcast %cst_19 : f32 to vector<8x16xf32>
    %20 = arith.cmpf ogt, %18, %19 : vector<8x16xf32>
    %cst_20 = arith.constant 2.000000e-01 : f32
    %21 = vector.broadcast %cst_20 : f32 to vector<8x16xf32>
    %22 = arith.mulf %21, %18 : vector<8x16xf32>
    %23 = arith.select %20, %18, %22 : vector<8x16xi1>, vector<8x16xf32>
    %24 = arith.addf %23, %11 : vector<8x16xf32>
    %cst_21 = arith.constant dense<0xFF800000> : vector<8xf32>
    %25 = vector.multi_reduction <maximumf>, %24, %cst_21 [1] : vector<8x16xf32> to vector<8xf32>
    %26 = vector.shape_cast %25 : vector<8xf32> to vector<8x1xf32>
    %27 = vector.broadcast %26 : vector<8x1xf32> to vector<8x16xf32>
    %28 = arith.subf %24, %27 : vector<8x16xf32>
    %29 = math.exp %28 : vector<8x16xf32>
    %cst_22 = arith.constant dense<0.000000e+00> : vector<8xf32>
    %30 = vector.multi_reduction <add>, %29, %cst_22 [1] : vector<8x16xf32> to vector<8xf32>
    %31 = vector.shape_cast %30 : vector<8xf32> to vector<8x1xf32>
    %32 = tpu.reciprocal %31 {approx = true} : vector<8x1xf32> -> vector<8x1xf32>
    %33 = vector.broadcast %32 : vector<8x1xf32> to vector<8x16xf32>
    %34 = arith.mulf %29, %33 : vector<8x16xf32>
    %35 = vector.extract_strided_slice %3 {offsets = [0, 0], sizes = [16, 8], strides = [1, 1]} : vector<16x16xf32> to vector<16x8xf32>
    %cst_23 = arith.constant dense<0.000000e+00> : vector<8x8xf32>
    %36 = tpu.matmul %34, %35, %cst_23 {dimension_numbers = #tpu.dot_dimension_numbers<[1], [0], [0], [1], [0, 0, 1, 1], [], []>} : vector<8x16xf32>, vector<16x8xf32>, vector<8x8xf32> -> vector<8x8xf32>
    %37 = vector.extract_strided_slice %12 {offsets = [0, 0], sizes = [1, 8], strides = [1, 1]} : vector<1x16xf32> to vector<1x8xf32>
    %38 = vector.broadcast %37 : vector<1x8xf32> to vector<8x8xf32>
    %39 = arith.addf %36, %38 : vector<8x8xf32>
    %cst_24 = arith.constant 0.000000e+00 : f32
    %40 = vector.broadcast %cst_24 : f32 to vector<8x8xf32>
    %41 = arith.cmpf ogt, %39, %40 : vector<8x8xf32>
    %cst_25 = arith.constant 0.000000e+00 : f32
    %42 = vector.broadcast %cst_25 : f32 to vector<8x8xf32>
    %43 = arith.minimumf %39, %42 : vector<8x8xf32>
    %44 = math.exp %43 : vector<8x8xf32>
    %cst_26 = arith.constant 1.000000e+00 : f32
    %45 = vector.broadcast %cst_26 : f32 to vector<8x8xf32>
    %46 = arith.subf %44, %45 : vector<8x8xf32>
    %47 = arith.select %41, %39, %46 : vector<8x8xi1>, vector<8x8xf32>
    %48 = vector.extract_strided_slice %6 {offsets = [0, 0], sizes = [8, 8], strides = [1, 1]} : vector<8x16xf32> to vector<8x8xf32>
    %49 = arith.addf %47, %48 : vector<8x8xf32>
    %50 = vector.extract_strided_slice %13 {offsets = [0, 0], sizes = [1, 8], strides = [1, 1]} : vector<1x16xf32> to vector<1x8xf32>
    %51 = vector.broadcast %50 : vector<1x8xf32> to vector<8x8xf32>
    %52 = arith.addf %49, %51 : vector<8x8xf32>
    %c0_27 = arith.constant 0 : index
    %c0_28 = arith.constant 0 : index
    %53 = vector.load %arg10[%c0_27, %c0_28] : memref<8x16xf32, #tpu.memory_space<vmem>>, vector<8x8xf32>
    tpu.vector_store %arg10[%c0_27, %c0_28], %52 {strides = array<i32>} : memref<8x16xf32, #tpu.memory_space<vmem>>, vector<8x8xf32>,
    %54 = vector.extract_strided_slice %7 {offsets = [0, 1], sizes = [8, 1], strides = [1, 1]} : vector<8x2xf32> to vector<8x1xf32>
    %55 = vector.extract_strided_slice %10 {offsets = [1, 0], sizes = [1, 16], strides = [1, 1]} : vector<2x16xf32> to vector<1x16xf32>
    %56 = vector.broadcast %54 : vector<8x1xf32> to vector<8x16xf32>
    %57 = vector.broadcast %55 : vector<1x16xf32> to vector<8x16xf32>
    %58 = arith.addf %56, %57 : vector<8x16xf32>
    %cst_29 = arith.constant 0.000000e+00 : f32
    %59 = vector.broadcast %cst_29 : f32 to vector<8x16xf32>
    %60 = arith.cmpf ogt, %58, %59 : vector<8x16xf32>
    %cst_30 = arith.constant 2.000000e-01 : f32
    %61 = vector.broadcast %cst_30 : f32 to vector<8x16xf32>
    %62 = arith.mulf %61, %58 : vector<8x16xf32>
    %63 = arith.select %60, %58, %62 : vector<8x16xi1>, vector<8x16xf32>
    %64 = arith.addf %63, %11 : vector<8x16xf32>
    %cst_31 = arith.constant dense<0xFF800000> : vector<8xf32>
    %65 = vector.multi_reduction <maximumf>, %64, %cst_31 [1] : vector<8x16xf32> to vector<8xf32>
    %66 = vector.shape_cast %65 : vector<8xf32> to vector<8x1xf32>
    %67 = vector.broadcast %66 : vector<8x1xf32> to vector<8x16xf32>
    %68 = arith.subf %64, %67 : vector<8x16xf32>
    %69 = math.exp %68 : vector<8x16xf32>
    %cst_32 = arith.constant dense<0.000000e+00> : vector<8xf32>
    %70 = vector.multi_reduction <add>, %69, %cst_32 [1] : vector<8x16xf32> to vector<8xf32>
    %71 = vector.shape_cast %70 : vector<8xf32> to vector<8x1xf32>
    %72 = tpu.reciprocal %71 {approx = true} : vector<8x1xf32> -> vector<8x1xf32>
    %73 = vector.broadcast %72 : vector<8x1xf32> to vector<8x16xf32>
    %74 = arith.mulf %69, %73 : vector<8x16xf32>
    %75 = vector.extract_strided_slice %3 {offsets = [0, 8], sizes = [16, 8], strides = [1, 1]} : vector<16x16xf32> to vector<16x8xf32>
    %cst_33 = arith.constant dense<0.000000e+00> : vector<8x8xf32>
    %76 = tpu.matmul %74, %75, %cst_33 {dimension_numbers = #tpu.dot_dimension_numbers<[1], [0], [0], [1], [0, 0, 1, 1], [], []>} : vector<8x16xf32>, vector<16x8xf32>, vector<8x8xf32> -> vector<8x8xf32>
    %77 = vector.extract_strided_slice %12 {offsets = [0, 8], sizes = [1, 8], strides = [1, 1]} : vector<1x16xf32> to vector<1x8xf32>
    %78 = vector.broadcast %77 : vector<1x8xf32> to vector<8x8xf32>
    %79 = arith.addf %76, %78 : vector<8x8xf32>
    %cst_34 = arith.constant 0.000000e+00 : f32
    %80 = vector.broadcast %cst_34 : f32 to vector<8x8xf32>
    %81 = arith.cmpf ogt, %79, %80 : vector<8x8xf32>
    %cst_35 = arith.constant 0.000000e+00 : f32
    %82 = vector.broadcast %cst_35 : f32 to vector<8x8xf32>
    %83 = arith.minimumf %79, %82 : vector<8x8xf32>
    %84 = math.exp %83 : vector<8x8xf32>
    %cst_36 = arith.constant 1.000000e+00 : f32
    %85 = vector.broadcast %cst_36 : f32 to vector<8x8xf32>
    %86 = arith.subf %84, %85 : vector<8x8xf32>
    %87 = arith.select %81, %79, %86 : vector<8x8xi1>, vector<8x8xf32>
    %88 = vector.extract_strided_slice %6 {offsets = [0, 8], sizes = [8, 8], strides = [1, 1]} : vector<8x16xf32> to vector<8x8xf32>
    %89 = arith.addf %87, %88 : vector<8x8xf32>
    %90 = vector.extract_strided_slice %13 {offsets = [0, 8], sizes = [1, 8], strides = [1, 1]} : vector<1x16xf32> to vector<1x8xf32>
    %91 = vector.broadcast %90 : vector<1x8xf32> to vector<8x8xf32>
    %92 = arith.addf %89, %91 : vector<8x8xf32>
    %c0_37 = arith.constant 0 : index
    %c8 = arith.constant 8 : index
    %93 = vector.load %arg10[%c0_37, %c8] : memref<8x16xf32, #tpu.memory_space<vmem>>, vector<8x8xf32>
    tpu.vector_store %arg10[%c0_37, %c8], %92 {strides = array<i32>} : memref<8x16xf32, #tpu.memory_space<vmem>>, vector<8x8xf32>,
    return
  }
  func.func @transform_0(%arg0: i32) -> (i32, i32) {
    %c0_i32 = arith.constant 0 : i32
    %c0_i32_0 = arith.constant 0 : i32
    return %arg0, %c0_i32 : i32, i32
  }
  func.func @transform_1(%arg0: i32) -> (i32, i32) {
    %c0_i32 = arith.constant 0 : i32
    %c0_i32_0 = arith.constant 0 : i32
    %c0_i32_1 = arith.constant 0 : i32
    return %c0_i32, %c0_i32_0 : i32, i32
  }
  func.func @transform_2(%arg0: i32) -> (i32, i32) {
    %c0_i32 = arith.constant 0 : i32
    %c0_i32_0 = arith.constant 0 : i32
    %c0_i32_1 = arith.constant 0 : i32
    return %c0_i32, %c0_i32_0 : i32, i32
  }
  func.func @transform_3(%arg0: i32) -> (i32, i32) {
    %c0_i32 = arith.constant 0 : i32
    %c0_i32_0 = arith.constant 0 : i32
    %c0_i32_1 = arith.constant 0 : i32
    return %c0_i32, %c0_i32_0 : i32, i32
  }
  func.func @transform_4(%arg0: i32) -> (i32, i32) {
    %c0_i32 = arith.constant 0 : i32
    %c0_i32_0 = arith.constant 0 : i32
    %c0_i32_1 = arith.constant 0 : i32
    return %c0_i32, %c0_i32_0 : i32, i32
  }
  func.func @transform_5(%arg0: i32) -> (i32, i32) {
    %c0_i32 = arith.constant 0 : i32
    %c0_i32_0 = arith.constant 0 : i32
    %c0_i32_1 = arith.constant 0 : i32
    return %c0_i32, %c0_i32_0 : i32, i32
  }
  func.func @transform_6(%arg0: i32) -> (i32, i32) {
    %c0_i32 = arith.constant 0 : i32
    %c0_i32_0 = arith.constant 0 : i32
    %c0_i32_1 = arith.constant 0 : i32
    return %c0_i32, %c0_i32_0 : i32, i32
  }
  func.func @transform_7(%arg0: i32) -> (i32, i32) {
    %c0_i32 = arith.constant 0 : i32
    %c0_i32_0 = arith.constant 0 : i32
    %c0_i32_1 = arith.constant 0 : i32
    return %c0_i32, %c0_i32_0 : i32, i32
  }
  func.func @transform_8(%arg0: i32) -> (i32, i32) {
    %c0_i32 = arith.constant 0 : i32
    %c0_i32_0 = arith.constant 0 : i32
    return %arg0, %c0_i32 : i32, i32
  }
  func.func @transform_9(%arg0: i32) -> (i32, i32) {
    %c0_i32 = arith.constant 0 : i32
    %c0_i32_0 = arith.constant 0 : i32
    return %arg0, %c0_i32 : i32, i32
  }
}

module attributes {stable_mosaic.version = 11 : i64} {
  func.func @gat_skip_kernel(%arg0: i32, %arg1: memref<8x16xf32, #tpu.memory_space<vmem>>, %arg2: memref<16x16xf32, #tpu.memory_space<vmem>>, %arg3: memref<16x16xf32, #tpu.memory_space<vmem>>, %arg4: memref<16x16xf32, #tpu.memory_space<vmem>>, %arg5: memref<16x18xf32, #tpu.memory_space<vmem>>, %arg6: memref<2x16xf32, #tpu.memory_space<vmem>>, %arg7: memref<1x16xf32, #tpu.memory_space<vmem>>, %arg8: memref<1x16xf32, #tpu.memory_space<vmem>>, %arg9: memref<8x16xf32, #tpu.memory_space<vmem>>, %arg10: memref<8x16xf32, #tpu.memory_space<vmem>>) attributes {dimension_semantics = [#tpu.dimension_semantics<parallel>], iteration_bounds = array<i64: 2>, scalar_prefetch = 0 : i64, scratch_operands = 0 : i64, tpu.core_type = #tpu.core_type<tc>, window_params = [{transform_indices = @transform_0, window_bounds = array<i64: 8, 16>}, {pipeline_mode = #tpu.pipeline_mode<synchronous>, transform_indices = @transform_1, window_bounds = array<i64: 16, 16>}, {pipeline_mode = #tpu.pipeline_mode<synchronous>, transform_indices = @transform_2, window_bounds = array<i64: 16, 16>}, {pipeline_mode = #tpu.pipeline_mode<synchronous>, transform_indices = @transform_3, window_bounds = array<i64: 16, 16>}, {pipeline_mode = #tpu.pipeline_mode<synchronous>, transform_indices = @transform_4, window_bounds = array<i64: 16, 18>}, {pipeline_mode = #tpu.pipeline_mode<synchronous>, transform_indices = @transform_5, window_bounds = array<i64: 2, 16>}, {pipeline_mode = #tpu.pipeline_mode<synchronous>, transform_indices = @transform_6, window_bounds = array<i64: 1, 16>}, {pipeline_mode = #tpu.pipeline_mode<synchronous>, transform_indices = @transform_7, window_bounds = array<i64: 1, 16>}, {transform_indices = @transform_8, window_bounds = array<i64: 8, 16>}, {transform_indices = @transform_9, window_bounds = array<i64: 8, 16>}]} {
    %c0 = arith.constant 0 : index
    %c0_0 = arith.constant 0 : index
    %0 = vector.load %arg1[%c0, %c0_0] : memref<8x16xf32, #tpu.memory_space<vmem>>, vector<8x16xf32>
    %c0_1 = arith.constant 0 : index
    %c0_2 = arith.constant 0 : index
    %1 = vector.load %arg2[%c0_1, %c0_2] : memref<16x16xf32, #tpu.memory_space<vmem>>, vector<16x16xf32>
    %c0_3 = arith.constant 0 : index
    %c0_4 = arith.constant 0 : index
    %2 = vector.load %arg4[%c0_3, %c0_4] : memref<16x16xf32, #tpu.memory_space<vmem>>, vector<16x16xf32>
    %cst = arith.constant dense<0.000000e+00> : vector<16x16xf32>
    %3 = tpu.matmul %1, %2, %cst {dimension_numbers = #tpu.dot_dimension_numbers<[1], [0], [0], [1], [0, 0, 1, 1], [], []>} : vector<16x16xf32>, vector<16x16xf32>, vector<16x16xf32> -> vector<16x16xf32>
    %c0_5 = arith.constant 0 : index
    %c0_6 = arith.constant 0 : index
    %4 = vector.load %arg5[%c0_5, %c0_6] : memref<16x18xf32, #tpu.memory_space<vmem>>, vector<16x18xf32>
    %cst_7 = arith.constant dense<0.000000e+00> : vector<8x18xf32>
    %5 = tpu.matmul %0, %4, %cst_7 {dimension_numbers = #tpu.dot_dimension_numbers<[1], [0], [0], [1], [0, 0, 1, 1], [], []>} : vector<8x16xf32>, vector<16x18xf32>, vector<8x18xf32> -> vector<8x18xf32>
    %6 = vector.extract_strided_slice %5 {offsets = [0, 0], sizes = [8, 16], strides = [1, 1]} : vector<8x18xf32> to vector<8x16xf32>
    %7 = vector.extract_strided_slice %5 {offsets = [0, 16], sizes = [8, 2], strides = [1, 1]} : vector<8x18xf32> to vector<8x2xf32>
    %c0_8 = arith.constant 0 : index
    %c0_9 = arith.constant 0 : index
    %8 = vector.load %arg6[%c0_8, %c0_9] : memref<2x16xf32, #tpu.memory_space<vmem>>, vector<2x16xf32>
    %c0_10 = arith.constant 0 : index
    %c0_11 = arith.constant 0 : index
    %9 = vector.load %arg3[%c0_10, %c0_11] : memref<16x16xf32, #tpu.memory_space<vmem>>, vector<16x16xf32>
    %cst_12 = arith.constant dense<0.000000e+00> : vector<2x16xf32>
    %10 = tpu.matmul %8, %9, %cst_12 {dimension_numbers = #tpu.dot_dimension_numbers<[1], [0], [0], [1], [0, 0, 1, 1], [], []>} : vector<2x16xf32>, vector<16x16xf32>, vector<2x16xf32> -> vector<2x16xf32>
    %c0_13 = arith.constant 0 : index
    %c0_14 = arith.constant 0 : index
    %11 = vector.load %arg9[%c0_13, %c0_14] : memref<8x16xf32, #tpu.memory_space<vmem>>, vector<8x16xf32>
    %c0_15 = arith.constant 0 : index
    %c0_16 = arith.constant 0 : index
    %12 = vector.load %arg7[%c0_15, %c0_16] : memref<1x16xf32, #tpu.memory_space<vmem>>, vector<1x16xf32>
    %c0_17 = arith.constant 0 : index
    %c0_18 = arith.constant 0 : index
    %13 = vector.load %arg8[%c0_17, %c0_18] : memref<1x16xf32, #tpu.memory_space<vmem>>, vector<1x16xf32>
    %14 = vector.extract_strided_slice %7 {offsets = [0, 0], sizes = [8, 1], strides = [1, 1]} : vector<8x2xf32> to vector<8x1xf32>
    %15 = vector.extract_strided_slice %10 {offsets = [0, 0], sizes = [1, 16], strides = [1, 1]} : vector<2x16xf32> to vector<1x16xf32>
    %16 = vector.broadcast %14 : vector<8x1xf32> to vector<8x16xf32>
    %17 = vector.broadcast %15 : vector<1x16xf32> to vector<8x16xf32>
    %18 = arith.addf %16, %17 : vector<8x16xf32>
    %cst_19 = arith.constant 0.000000e+00 : f32
    %19 = vector.broadcast %cst_19 : f32 to vector<8x16xf32>
    %20 = arith.cmpf ogt, %18, %19 : vector<8x16xf32>
    %cst_20 = arith.constant 2.000000e-01 : f32
    %21 = vector.broadcast %cst_20 : f32 to vector<8x16xf32>
    %22 = arith.mulf %21, %18 : vector<8x16xf32>
    %23 = arith.select %20, %18, %22 : vector<8x16xi1>, vector<8x16xf32>
    %24 = arith.addf %23, %11 : vector<8x16xf32>
    %cst_21 = arith.constant dense<0xFF800000> : vector<8xf32>
    %25 = vector.multi_reduction <maximumf>, %24, %cst_21 [1] : vector<8x16xf32> to vector<8xf32>
    %26 = vector.shape_cast %25 : vector<8xf32> to vector<8x1xf32>
    %27 = vector.broadcast %26 : vector<8x1xf32> to vector<8x16xf32>
    %28 = arith.subf %24, %27 : vector<8x16xf32>
    %29 = math.exp %28 : vector<8x16xf32>
    %cst_22 = arith.constant dense<0.000000e+00> : vector<8xf32>
    %30 = vector.multi_reduction <add>, %29, %cst_22 [1] : vector<8x16xf32> to vector<8xf32>
    %31 = vector.shape_cast %30 : vector<8xf32> to vector<8x1xf32>
    %32 = tpu.reciprocal %31 {approx = true} : vector<8x1xf32> -> vector<8x1xf32>
    %33 = vector.broadcast %32 : vector<8x1xf32> to vector<8x16xf32>
    %34 = arith.mulf %29, %33 : vector<8x16xf32>
    %35 = vector.extract_strided_slice %3 {offsets = [0, 0], sizes = [16, 8], strides = [1, 1]} : vector<16x16xf32> to vector<16x8xf32>
    %cst_23 = arith.constant dense<0.000000e+00> : vector<8x8xf32>
    %36 = tpu.matmul %34, %35, %cst_23 {dimension_numbers = #tpu.dot_dimension_numbers<[1], [0], [0], [1], [0, 0, 1, 1], [], []>} : vector<8x16xf32>, vector<16x8xf32>, vector<8x8xf32> -> vector<8x8xf32>
    %37 = vector.extract_strided_slice %12 {offsets = [0, 0], sizes = [1, 8], strides = [1, 1]} : vector<1x16xf32> to vector<1x8xf32>
    %38 = vector.broadcast %37 : vector<1x8xf32> to vector<8x8xf32>
    %39 = arith.addf %36, %38 : vector<8x8xf32>
    %cst_24 = arith.constant 0.000000e+00 : f32
    %40 = vector.broadcast %cst_24 : f32 to vector<8x8xf32>
    %41 = arith.cmpf ogt, %39, %40 : vector<8x8xf32>
    %cst_25 = arith.constant 0.000000e+00 : f32
    %42 = vector.broadcast %cst_25 : f32 to vector<8x8xf32>
    %43 = arith.minimumf %39, %42 : vector<8x8xf32>
    %44 = math.exp %43 : vector<8x8xf32>
    %cst_26 = arith.constant 1.000000e+00 : f32
    %45 = vector.broadcast %cst_26 : f32 to vector<8x8xf32>
    %46 = arith.subf %44, %45 : vector<8x8xf32>
    %47 = arith.select %41, %39, %46 : vector<8x8xi1>, vector<8x8xf32>
    %48 = vector.extract_strided_slice %6 {offsets = [0, 0], sizes = [8, 8], strides = [1, 1]} : vector<8x16xf32> to vector<8x8xf32>
    %49 = arith.addf %47, %48 : vector<8x8xf32>
    %50 = vector.extract_strided_slice %13 {offsets = [0, 0], sizes = [1, 8], strides = [1, 1]} : vector<1x16xf32> to vector<1x8xf32>
    %51 = vector.broadcast %50 : vector<1x8xf32> to vector<8x8xf32>
    %52 = arith.addf %49, %51 : vector<8x8xf32>
    %c0_27 = arith.constant 0 : index
    %c0_28 = arith.constant 0 : index
    %53 = vector.load %arg10[%c0_27, %c0_28] : memref<8x16xf32, #tpu.memory_space<vmem>>, vector<8x8xf32>
    tpu.vector_store %arg10[%c0_27, %c0_28], %52 {strides = array<i32>} : memref<8x16xf32, #tpu.memory_space<vmem>>, vector<8x8xf32>,
    %54 = vector.extract_strided_slice %7 {offsets = [0, 1], sizes = [8, 1], strides = [1, 1]} : vector<8x2xf32> to vector<8x1xf32>
    %55 = vector.extract_strided_slice %10 {offsets = [1, 0], sizes = [1, 16], strides = [1, 1]} : vector<2x16xf32> to vector<1x16xf32>
    %56 = vector.broadcast %54 : vector<8x1xf32> to vector<8x16xf32>
    %57 = vector.broadcast %55 : vector<1x16xf32> to vector<8x16xf32>
    %58 = arith.addf %56, %57 : vector<8x16xf32>
    %cst_29 = arith.constant 0.000000e+00 : f32
    %59 = vector.broadcast %cst_29 : f32 to vector<8x16xf32>
    %60 = arith.cmpf ogt, %58, %59 : vector<8x16xf32>
    %cst_30 = arith.constant 2.000000e-01 : f32
    %61 = vector.broadcast %cst_30 : f32 to vector<8x16xf32>
    %62 = arith.mulf %61, %58 : vector<8x16xf32>
    %63 = arith.select %60, %58, %62 : vector<8x16xi1>, vector<8x16xf32>
    %64 = arith.addf %63, %11 : vector<8x16xf32>
    %cst_31 = arith.constant dense<0xFF800000> : vector<8xf32>
    %65 = vector.multi_reduction <maximumf>, %64, %cst_31 [1] : vector<8x16xf32> to vector<8xf32>
    %66 = vector.shape_cast %65 : vector<8xf32> to vector<8x1xf32>
    %67 = vector.broadcast %66 : vector<8x1xf32> to vector<8x16xf32>
    %68 = arith.subf %64, %67 : vector<8x16xf32>
    %69 = math.exp %68 : vector<8x16xf32>
    %cst_32 = arith.constant dense<0.000000e+00> : vector<8xf32>
    %70 = vector.multi_reduction <add>, %69, %cst_32 [1] : vector<8x16xf32> to vector<8xf32>
    %71 = vector.shape_cast %70 : vector<8xf32> to vector<8x1xf32>
    %72 = tpu.reciprocal %71 {approx = true} : vector<8x1xf32> -> vector<8x1xf32>
    %73 = vector.broadcast %72 : vector<8x1xf32> to vector<8x16xf32>
    %74 = arith.mulf %69, %73 : vector<8x16xf32>
    %75 = vector.extract_strided_slice %3 {offsets = [0, 8], sizes = [16, 8], strides = [1, 1]} : vector<16x16xf32> to vector<16x8xf32>
    %cst_33 = arith.constant dense<0.000000e+00> : vector<8x8xf32>
    %76 = tpu.matmul %74, %75, %cst_33 {dimension_numbers = #tpu.dot_dimension_numbers<[1], [0], [0], [1], [0, 0, 1, 1], [], []>} : vector<8x16xf32>, vector<16x8xf32>, vector<8x8xf32> -> vector<8x8xf32>
    %77 = vector.extract_strided_slice %12 {offsets = [0, 8], sizes = [1, 8], strides = [1, 1]} : vector<1x16xf32> to vector<1x8xf32>
    %78 = vector.broadcast %77 : vector<1x8xf32> to vector<8x8xf32>
    %79 = arith.addf %76, %78 : vector<8x8xf32>
    %cst_34 = arith.constant 0.000000e+00 : f32
    %80 = vector.broadcast %cst_34 : f32 to vector<8x8xf32>
    %81 = arith.cmpf ogt, %79, %80 : vector<8x8xf32>
    %cst_35 = arith.constant 0.000000e+00 : f32
    %82 = vector.broadcast %cst_35 : f32 to vector<8x8xf32>
    %83 = arith.minimumf %79, %82 : vector<8x8xf32>
    %84 = math.exp %83 : vector<8x8xf32>
    %cst_36 = arith.constant 1.000000e+00 : f32
    %85 = vector.broadcast %cst_36 : f32 to vector<8x8xf32>
    %86 = arith.subf %84, %85 : vector<8x8xf32>
    %87 = arith.select %81, %79, %86 : vector<8x8xi1>, vector<8x8xf32>
    %88 = vector.extract_strided_slice %6 {offsets = [0, 8], sizes = [8, 8], strides = [1, 1]} : vector<8x16xf32> to vector<8x8xf32>
    %89 = arith.addf %87, %88 : vector<8x8xf32>
    %90 = vector.extract_strided_slice %13 {offsets = [0, 8], sizes = [1, 8], strides = [1, 1]} : vector<1x16xf32> to vector<1x8xf32>
    %91 = vector.broadcast %90 : vector<1x8xf32> to vector<8x8xf32>
    %92 = arith.addf %89, %91 : vector<8x8xf32>
    %c0_37 = arith.constant 0 : index
    %c8 = arith.constant 8 : index
    %93 = vector.load %arg10[%c0_37, %c8] : memref<8x16xf32, #tpu.memory_space<vmem>>, vector<8x8xf32>
    tpu.vector_store %arg10[%c0_37, %c8], %92 {strides = array<i32>} : memref<8x16xf32, #tpu.memory_space<vmem>>, vector<8x8xf32>,
    return
  }
  func.func @transform_0(%arg0: i32) -> (i32, i32) {
    %c0_i32 = arith.constant 0 : i32
    %c0_i32_0 = arith.constant 0 : i32
    return %arg0, %c0_i32 : i32, i32
  }
  func.func @transform_1(%arg0: i32) -> (i32, i32) {
    %c0_i32 = arith.constant 0 : i32
    %c0_i32_0 = arith.constant 0 : i32
    %c0_i32_1 = arith.constant 0 : i32
    return %c0_i32, %c0_i32_0 : i32, i32
  }
  func.func @transform_2(%arg0: i32) -> (i32, i32) {
    %c0_i32 = arith.constant 0 : i32
    %c0_i32_0 = arith.constant 0 : i32
    %c0_i32_1 = arith.constant 0 : i32
    return %c0_i32, %c0_i32_0 : i32, i32
  }
  func.func @transform_3(%arg0: i32) -> (i32, i32) {
    %c0_i32 = arith.constant 0 : i32
    %c0_i32_0 = arith.constant 0 : i32
    %c0_i32_1 = arith.constant 0 : i32
    return %c0_i32, %c0_i32_0 : i32, i32
  }
  func.func @transform_4(%arg0: i32) -> (i32, i32) {
    %c0_i32 = arith.constant 0 : i32
    %c0_i32_0 = arith.constant 0 : i32
    %c0_i32_1 = arith.constant 0 : i32
    return %c0_i32, %c0_i32_0 : i32, i32
  }
  func.func @transform_5(%arg0: i32) -> (i32, i32) {
    %c0_i32 = arith.constant 0 : i32
    %c0_i32_0 = arith.constant 0 : i32
    %c0_i32_1 = arith.constant 0 : i32
    return %c0_i32, %c0_i32_0 : i32, i32
  }
  func.func @transform_6(%arg0: i32) -> (i32, i32) {
    %c0_i32 = arith.constant 0 : i32
    %c0_i32_0 = arith.constant 0 : i32
    %c0_i32_1 = arith.constant 0 : i32
    return %c0_i32, %c0_i32_0 : i32, i32
  }
  func.func @transform_7(%arg0: i32) -> (i32, i32) {
    %c0_i32 = arith.constant 0 : i32
    %c0_i32_0 = arith.constant 0 : i32
    %c0_i32_1 = arith.constant 0 : i32
    return %c0_i32, %c0_i32_0 : i32, i32
  }
  func.func @transform_8(%arg0: i32) -> (i32, i32) {
    %c0_i32 = arith.constant 0 : i32
    %c0_i32_0 = arith.constant 0 : i32
    return %arg0, %c0_i32 : i32, i32
  }
  func.func @transform_9(%arg0: i32) -> (i32, i32) {
    %c0_i32 = arith.constant 0 : i32
    %c0_i32_0 = arith.constant 0 : i32
    return %arg0, %c0_i32 : i32, i32
  }
}

module attributes {stable_mosaic.version = 11 : i64} {
  func.func @gat_skip_kernel(%arg0: i32, %arg1: memref<8x16xf32, #tpu.memory_space<vmem>>, %arg2: memref<16x16xf32, #tpu.memory_space<vmem>>, %arg3: memref<16x16xf32, #tpu.memory_space<vmem>>, %arg4: memref<16x8xf32, #tpu.memory_space<vmem>>, %arg5: memref<16x9xf32, #tpu.memory_space<vmem>>, %arg6: memref<1x16xf32, #tpu.memory_space<vmem>>, %arg7: memref<1x8xf32, #tpu.memory_space<vmem>>, %arg8: memref<1x8xf32, #tpu.memory_space<vmem>>, %arg9: memref<8x16xf32, #tpu.memory_space<vmem>>, %arg10: memref<8x8xf32, #tpu.memory_space<vmem>>) attributes {dimension_semantics = [#tpu.dimension_semantics<parallel>], iteration_bounds = array<i64: 2>, scalar_prefetch = 0 : i64, scratch_operands = 0 : i64, tpu.core_type = #tpu.core_type<tc>, window_params = [{transform_indices = @transform_0, window_bounds = array<i64: 8, 16>}, {pipeline_mode = #tpu.pipeline_mode<synchronous>, transform_indices = @transform_1, window_bounds = array<i64: 16, 16>}, {pipeline_mode = #tpu.pipeline_mode<synchronous>, transform_indices = @transform_2, window_bounds = array<i64: 16, 16>}, {pipeline_mode = #tpu.pipeline_mode<synchronous>, transform_indices = @transform_3, window_bounds = array<i64: 16, 8>}, {pipeline_mode = #tpu.pipeline_mode<synchronous>, transform_indices = @transform_4, window_bounds = array<i64: 16, 9>}, {pipeline_mode = #tpu.pipeline_mode<synchronous>, transform_indices = @transform_5, window_bounds = array<i64: 1, 16>}, {pipeline_mode = #tpu.pipeline_mode<synchronous>, transform_indices = @transform_6, window_bounds = array<i64: 1, 8>}, {pipeline_mode = #tpu.pipeline_mode<synchronous>, transform_indices = @transform_7, window_bounds = array<i64: 1, 8>}, {transform_indices = @transform_8, window_bounds = array<i64: 8, 16>}, {transform_indices = @transform_9, window_bounds = array<i64: 8, 8>}]} {
    %c0 = arith.constant 0 : index
    %c0_0 = arith.constant 0 : index
    %0 = vector.load %arg1[%c0, %c0_0] : memref<8x16xf32, #tpu.memory_space<vmem>>, vector<8x16xf32>
    %c0_1 = arith.constant 0 : index
    %c0_2 = arith.constant 0 : index
    %1 = vector.load %arg2[%c0_1, %c0_2] : memref<16x16xf32, #tpu.memory_space<vmem>>, vector<16x16xf32>
    %c0_3 = arith.constant 0 : index
    %c0_4 = arith.constant 0 : index
    %2 = vector.load %arg4[%c0_3, %c0_4] : memref<16x8xf32, #tpu.memory_space<vmem>>, vector<16x8xf32>
    %cst = arith.constant dense<0.000000e+00> : vector<16x8xf32>
    %3 = tpu.matmul %1, %2, %cst {dimension_numbers = #tpu.dot_dimension_numbers<[1], [0], [0], [1], [0, 0, 1, 1], [], []>} : vector<16x16xf32>, vector<16x8xf32>, vector<16x8xf32> -> vector<16x8xf32>
    %c0_5 = arith.constant 0 : index
    %c0_6 = arith.constant 0 : index
    %4 = vector.load %arg5[%c0_5, %c0_6] : memref<16x9xf32, #tpu.memory_space<vmem>>, vector<16x9xf32>
    %cst_7 = arith.constant dense<0.000000e+00> : vector<8x9xf32>
    %5 = tpu.matmul %0, %4, %cst_7 {dimension_numbers = #tpu.dot_dimension_numbers<[1], [0], [0], [1], [0, 0, 1, 1], [], []>} : vector<8x16xf32>, vector<16x9xf32>, vector<8x9xf32> -> vector<8x9xf32>
    %6 = vector.extract_strided_slice %5 {offsets = [0, 0], sizes = [8, 8], strides = [1, 1]} : vector<8x9xf32> to vector<8x8xf32>
    %7 = vector.extract_strided_slice %5 {offsets = [0, 8], sizes = [8, 1], strides = [1, 1]} : vector<8x9xf32> to vector<8x1xf32>
    %c0_8 = arith.constant 0 : index
    %c0_9 = arith.constant 0 : index
    %8 = vector.load %arg6[%c0_8, %c0_9] : memref<1x16xf32, #tpu.memory_space<vmem>>, vector<1x16xf32>
    %c0_10 = arith.constant 0 : index
    %c0_11 = arith.constant 0 : index
    %9 = vector.load %arg3[%c0_10, %c0_11] : memref<16x16xf32, #tpu.memory_space<vmem>>, vector<16x16xf32>
    %cst_12 = arith.constant dense<0.000000e+00> : vector<1x16xf32>
    %10 = tpu.matmul %8, %9, %cst_12 {dimension_numbers = #tpu.dot_dimension_numbers<[1], [0], [0], [1], [0, 0, 1, 1], [], []>} : vector<1x16xf32>, vector<16x16xf32>, vector<1x16xf32> -> vector<1x16xf32>
    %c0_13 = arith.constant 0 : index
    %c0_14 = arith.constant 0 : index
    %11 = vector.load %arg9[%c0_13, %c0_14] : memref<8x16xf32, #tpu.memory_space<vmem>>, vector<8x16xf32>
    %c0_15 = arith.constant 0 : index
    %c0_16 = arith.constant 0 : index
    %12 = vector.load %arg7[%c0_15, %c0_16] : memref<1x8xf32, #tpu.memory_space<vmem>>, vector<1x8xf32>
    %c0_17 = arith.constant 0 : index
    %c0_18 = arith.constant 0 : index
    %13 = vector.load %arg8[%c0_17, %c0_18] : memref<1x8xf32, #tpu.memory_space<vmem>>, vector<1x8xf32>
    %14 = vector.broadcast %7 : vector<8x1xf32> to vector<8x16xf32>
    %15 = vector.broadcast %10 : vector<1x16xf32> to vector<8x16xf32>
    %16 = arith.addf %14, %15 : vector<8x16xf32>
    %cst_19 = arith.constant 0.000000e+00 : f32
    %17 = vector.broadcast %cst_19 : f32 to vector<8x16xf32>
    %18 = arith.cmpf ogt, %16, %17 : vector<8x16xf32>
    %cst_20 = arith.constant 2.000000e-01 : f32
    %19 = vector.broadcast %cst_20 : f32 to vector<8x16xf32>
    %20 = arith.mulf %19, %16 : vector<8x16xf32>
    %21 = arith.select %18, %16, %20 : vector<8x16xi1>, vector<8x16xf32>
    %22 = arith.addf %21, %11 : vector<8x16xf32>
    %cst_21 = arith.constant dense<0xFF800000> : vector<8xf32>
    %23 = vector.multi_reduction <maximumf>, %22, %cst_21 [1] : vector<8x16xf32> to vector<8xf32>
    %24 = vector.shape_cast %23 : vector<8xf32> to vector<8x1xf32>
    %25 = vector.broadcast %24 : vector<8x1xf32> to vector<8x16xf32>
    %26 = arith.subf %22, %25 : vector<8x16xf32>
    %27 = math.exp %26 : vector<8x16xf32>
    %cst_22 = arith.constant dense<0.000000e+00> : vector<8xf32>
    %28 = vector.multi_reduction <add>, %27, %cst_22 [1] : vector<8x16xf32> to vector<8xf32>
    %29 = vector.shape_cast %28 : vector<8xf32> to vector<8x1xf32>
    %30 = tpu.reciprocal %29 {approx = true} : vector<8x1xf32> -> vector<8x1xf32>
    %31 = vector.broadcast %30 : vector<8x1xf32> to vector<8x16xf32>
    %32 = arith.mulf %27, %31 : vector<8x16xf32>
    %cst_23 = arith.constant dense<0.000000e+00> : vector<8x8xf32>
    %33 = tpu.matmul %32, %3, %cst_23 {dimension_numbers = #tpu.dot_dimension_numbers<[1], [0], [0], [1], [0, 0, 1, 1], [], []>} : vector<8x16xf32>, vector<16x8xf32>, vector<8x8xf32> -> vector<8x8xf32>
    %34 = vector.broadcast %12 : vector<1x8xf32> to vector<8x8xf32>
    %35 = arith.addf %33, %34 : vector<8x8xf32>
    %36 = arith.addf %35, %6 : vector<8x8xf32>
    %37 = vector.broadcast %13 : vector<1x8xf32> to vector<8x8xf32>
    %38 = arith.addf %36, %37 : vector<8x8xf32>
    %c0_24 = arith.constant 0 : index
    %c0_25 = arith.constant 0 : index
    %39 = vector.load %arg10[%c0_24, %c0_25] : memref<8x8xf32, #tpu.memory_space<vmem>>, vector<8x8xf32>
    tpu.vector_store %arg10[%c0_24, %c0_25], %38 {strides = array<i32>} : memref<8x8xf32, #tpu.memory_space<vmem>>, vector<8x8xf32>,
    return
  }
  func.func @transform_0(%arg0: i32) -> (i32, i32) {
    %c0_i32 = arith.constant 0 : i32
    %c0_i32_0 = arith.constant 0 : i32
    return %arg0, %c0_i32 : i32, i32
  }
  func.func @transform_1(%arg0: i32) -> (i32, i32) {
    %c0_i32 = arith.constant 0 : i32
    %c0_i32_0 = arith.constant 0 : i32
    %c0_i32_1 = arith.constant 0 : i32
    return %c0_i32, %c0_i32_0 : i32, i32
  }
  func.func @transform_2(%arg0: i32) -> (i32, i32) {
    %c0_i32 = arith.constant 0 : i32
    %c0_i32_0 = arith.constant 0 : i32
    %c0_i32_1 = arith.constant 0 : i32
    return %c0_i32, %c0_i32_0 : i32, i32
  }
  func.func @transform_3(%arg0: i32) -> (i32, i32) {
    %c0_i32 = arith.constant 0 : i32
    %c0_i32_0 = arith.constant 0 : i32
    %c0_i32_1 = arith.constant 0 : i32
    return %c0_i32, %c0_i32_0 : i32, i32
  }
  func.func @transform_4(%arg0: i32) -> (i32, i32) {
    %c0_i32 = arith.constant 0 : i32
    %c0_i32_0 = arith.constant 0 : i32
    %c0_i32_1 = arith.constant 0 : i32
    return %c0_i32, %c0_i32_0 : i32, i32
  }
  func.func @transform_5(%arg0: i32) -> (i32, i32) {
    %c0_i32 = arith.constant 0 : i32
    %c0_i32_0 = arith.constant 0 : i32
    %c0_i32_1 = arith.constant 0 : i32
    return %c0_i32, %c0_i32_0 : i32, i32
  }
  func.func @transform_6(%arg0: i32) -> (i32, i32) {
    %c0_i32 = arith.constant 0 : i32
    %c0_i32_0 = arith.constant 0 : i32
    %c0_i32_1 = arith.constant 0 : i32
    return %c0_i32, %c0_i32_0 : i32, i32
  }
  func.func @transform_7(%arg0: i32) -> (i32, i32) {
    %c0_i32 = arith.constant 0 : i32
    %c0_i32_0 = arith.constant 0 : i32
    %c0_i32_1 = arith.constant 0 : i32
    return %c0_i32, %c0_i32_0 : i32, i32
  }
  func.func @transform_8(%arg0: i32) -> (i32, i32) {
    %c0_i32 = arith.constant 0 : i32
    %c0_i32_0 = arith.constant 0 : i32
    return %arg0, %c0_i32 : i32, i32
  }
  func.func @transform_9(%arg0: i32) -> (i32, i32) {
    %c0_i32 = arith.constant 0 : i32
    %c0_i32_0 = arith.constant 0 : i32
    return %arg0, %c0_i32 : i32, i32
  }
}

module attributes {stable_mosaic.version = 11 : i64} {
  func.func @edge_mlp_kernel(%arg0: memref<8x8xf32, #tpu.memory_space<vmem>>, %arg1: memref<8x8xf32, #tpu.memory_space<vmem>>, %arg2: memref<8x8xf32, #tpu.memory_space<vmem>>, %arg3: memref<8x8xf32, #tpu.memory_space<vmem>>, %arg4: memref<1x8xf32, #tpu.memory_space<vmem>>, %arg5: memref<8x1xf32, #tpu.memory_space<vmem>>, %arg6: memref<1x1xf32, #tpu.memory_space<vmem>>, %arg7: memref<8x1xf32, #tpu.memory_space<vmem>>) attributes {dimension_semantics = [], scalar_prefetch = 0 : i64, scratch_operands = 0 : i64, tpu.core_type = #tpu.core_type<tc>} {
    %c0 = arith.constant 0 : index
    %c0_0 = arith.constant 0 : index
    %0 = vector.load %arg0[%c0, %c0_0] : memref<8x8xf32, #tpu.memory_space<vmem>>, vector<8x8xf32>
    %c0_1 = arith.constant 0 : index
    %c0_2 = arith.constant 0 : index
    %1 = vector.load %arg2[%c0_1, %c0_2] : memref<8x8xf32, #tpu.memory_space<vmem>>, vector<8x8xf32>
    %cst = arith.constant dense<0.000000e+00> : vector<8x8xf32>
    %2 = tpu.matmul %0, %1, %cst {dimension_numbers = #tpu.dot_dimension_numbers<[1], [0], [0], [1], [0, 0, 1, 1], [], []>} : vector<8x8xf32>, vector<8x8xf32>, vector<8x8xf32> -> vector<8x8xf32>
    %c0_3 = arith.constant 0 : index
    %c0_4 = arith.constant 0 : index
    %3 = vector.load %arg1[%c0_3, %c0_4] : memref<8x8xf32, #tpu.memory_space<vmem>>, vector<8x8xf32>
    %c0_5 = arith.constant 0 : index
    %c0_6 = arith.constant 0 : index
    %4 = vector.load %arg3[%c0_5, %c0_6] : memref<8x8xf32, #tpu.memory_space<vmem>>, vector<8x8xf32>
    %cst_7 = arith.constant dense<0.000000e+00> : vector<8x8xf32>
    %5 = tpu.matmul %3, %4, %cst_7 {dimension_numbers = #tpu.dot_dimension_numbers<[1], [0], [0], [1], [0, 0, 1, 1], [], []>} : vector<8x8xf32>, vector<8x8xf32>, vector<8x8xf32> -> vector<8x8xf32>
    %6 = arith.addf %2, %5 : vector<8x8xf32>
    %c0_8 = arith.constant 0 : index
    %c0_9 = arith.constant 0 : index
    %7 = vector.load %arg4[%c0_8, %c0_9] : memref<1x8xf32, #tpu.memory_space<vmem>>, vector<1x8xf32>
    %8 = vector.broadcast %7 : vector<1x8xf32> to vector<8x8xf32>
    %9 = arith.addf %6, %8 : vector<8x8xf32>
    %cst_10 = arith.constant 0.000000e+00 : f32
    %10 = vector.broadcast %cst_10 : f32 to vector<8x8xf32>
    %11 = arith.maximumf %9, %10 : vector<8x8xf32>
    %c0_11 = arith.constant 0 : index
    %c0_12 = arith.constant 0 : index
    %12 = vector.load %arg5[%c0_11, %c0_12] : memref<8x1xf32, #tpu.memory_space<vmem>>, vector<8x1xf32>
    %cst_13 = arith.constant dense<0.000000e+00> : vector<8x1xf32>
    %13 = tpu.matmul %11, %12, %cst_13 {dimension_numbers = #tpu.dot_dimension_numbers<[1], [0], [0], [1], [0, 0, 1, 1], [], []>} : vector<8x8xf32>, vector<8x1xf32>, vector<8x1xf32> -> vector<8x1xf32>
    %c0_14 = arith.constant 0 : index
    %c0_15 = arith.constant 0 : index
    %14 = vector.load %arg6[%c0_14, %c0_15] : memref<1x1xf32, #tpu.memory_space<vmem>>, vector<1x1xf32>
    %15 = vector.broadcast %14 : vector<1x1xf32> to vector<8x1xf32>
    %16 = arith.addf %13, %15 : vector<8x1xf32>
    %c0_16 = arith.constant 0 : index
    %c0_17 = arith.constant 0 : index
    %17 = vector.load %arg7[%c0_16, %c0_17] : memref<8x1xf32, #tpu.memory_space<vmem>>, vector<8x1xf32>
    tpu.vector_store %arg7[%c0_16, %c0_17], %16 {strides = array<i32>} : memref<8x1xf32, #tpu.memory_space<vmem>>, vector<8x1xf32>,
    return
  }
}

</mosaic_0001>

<bundles_post_ra>
// kernel: deep_gat_forward.4
= control target key start
LH: loop header
LB: loop body
LE: loop exit
PB: predicated region body
PF: predicated region fallthrough
CT: control target
= control target key end

     0   :  { %s746_s30 = smov 0   ;;  %s812_s0 = inlined_call_operand.vmem [shape: f32[16,8], index: 0, kind: input, shape index: {}, may-alias: {0,1}]   ;;  %s813_s1 = inlined_call_operand.vmem [shape: f32[16,8], index: 1, kind: input, shape index: {}, may-alias: {0,1}]   ;;  %s814_s2 = inlined_call_operand.vmem [shape: f32[8,16], index: 2, kind: input, shape index: {}]   ;;  %s815_s3 = inlined_call_operand.vmem [shape: f32[8,16], index: 3, kind: input, shape index: {}]   ;;  %s816_s4 = inlined_call_operand.vmem [shape: f32[8,18], index: 4, kind: input, shape index: {}]   ;;  %s817_s5 = inlined_call_operand.vmem [shape: f32[2,8], index: 5, kind: input, shape index: {}]   ;;  %s818_s6 = inlined_call_operand.vmem [shape: f32[1,16], index: 6, kind: input, shape index: {}]   ;;  %s819_s7 = inlined_call_operand.vmem [shape: f32[1,16], index: 7, kind: input, shape index: {}]   ;;  %s820_s8 = inlined_call_operand.vmem [shape: f32[16,16], index: 8, kind: input, shape index: {}]   ;;  %s821_s9 = inlined_call_operand.vmem [shape: f32[16,16], index: 9, kind: output, shape index: {}]  }
   0x1 LB: > { %s632_s10 = sadd.s32 4294967295, %s690_s30   ;;  %p636_p0 = scmp.ge.s32.totalorder %s690_s30, 1  ;;  %s690_s30 = sphi %s746_s30, %s19_s30  }
   0x2   : > { %p295_p1 = scmp.lt.s32.totalorder %s690_s30, 3 }
   0x4   : > { %p296_p2 = pnand %p636_p0, %p295_p1 }
   0x5   : > { %p333_p3 = scmp.lt.s32.totalorder (!%p296_p2), %s632_s10, 1  ;;  %s695_s15 = smov (!%p296_p2), 8  }
   0x6   : > { %299 = sbr.rel (%p296_p2) target bundleno = 759 (0x2f7), region = 56 }
   0xb   : > { %v379_v0 = vld [vmem:[%s816_s4] sm:$0xff]  ;;  %vm349_vm0 = vcmask 64512   ;;  %s823_s10 = smov (!%p333_p3, %s632_s10), 1  ;;  %v692_v3 = vmov 17   ;;  %v693_v6 = vmov 16   ;;  %v347_v9 = vld [vmem:[%s813_s1 + $0x8] sm:$0xff] }
   0xc   : > { %v404_v1 = vld [vmem:[%s814_s2] sm:$0xff]  ;;  %398 = vmatpush.msra.mxu1 %v379_v0  ;;  %662 = vset.pattern.permute.xlu0 %v692_v3  ;;  %s764_s17 = sshll.u32 %s823_s10, 3  ;;  %vm442_vm2 = vcmask 130048   ;;  %s694_s10 = smov 120   ;;  %vm565_vm6 = vcmask 130112  }
   0xd   : > { %v403_v2 = vld [vmem:[%s817_s5] sm:$0x3]  ;;  %423 = vmatpush.msra.mxu2 %v404_v1  ;;  %s336_s20 = scalar_lea.vmem %s812_s0, %s764_s17  ;;  %s340_s29 = scalar_lea.vmem %s820_s8, %s764_s17 }
   0xe   : > { %643 = vmatmul.msk.f32.vlgmr.msra.gmra.mxu2 %vm349_vm0, %v403_v2  ;;  %v345_v4 = vld [vmem:[%s336_s20] sm:$0xff]  ;;  %s344_s19 = scalar_lea.vmem %s821_s9, %s764_s17 }
   0xf   : > { %642 = vmatmul.msk.f32.vlgmr.msra.gmra.mxu1 %vm349_vm0, %v345_v4  ;;  %v348_v7 = vld [vmem:[%s815_s3] sm:$0xff] }
  0x10   : > { %v346_v8 = vld [vmem:[%s813_s1] sm:$0xff]  ;;  %371 = vmatpush.msra.mxu0 %v348_v7 }
  0x11   : > { %640 = vmatmul.msk.f32.vlgmr.msra.gmra.mxu0 %vm349_vm0, %v346_v8  ;;  %v428_v15 = vld [vmem:[%s340_s29] sm:$0xff] }
  0x12   : > { %v670_v39 = vld [vmem:[%s818_s6] ss:$0 sm:$0xff] }
  0x13   : > { %v671_v41 = vld [vmem:[%s819_s7] ss:$0 sm:$0xff] }
  0x19   : > { %641 = vmatmul.msk.f32.gmra.mxu0 %vm349_vm0, %v347_v9 }
  0x8c   : > { %v771_v5 = vpop.f32.mrf.mxu1 }
  0x8d   : > { %493 = vperm.xlu0 %662, %v771_v5  }
  0x8e   : > { %v373_v26 = vpop.f32.mrf.mxu0 }
  0x91   : > { %v425_v10 = vpop.f32.mrf.mxu2 }
  0x92   : > { %v496_v11 = vperm.slane %v425_v10, 1  ;;  %v436_v18 = vperm.slane %v425_v10, 0 }
  0x95   : > { %663 = vset.pattern.permute.xlu0 %v693_v6 }
  0x96   : > { %433 = vperm.xlu0 %663, %v771_v5   ;;  %v376_v27 = vpop.f32.mrf.mxu0 }
  0x97   : > { %474 = vmatpush.msra.mxu3 %v376_v27  ;;  %v664_v38 = vpack.i.bf16 %v373_v26, %v376_v27 }
  0x99   : > { %475 = vmatpush.msra.mxu3 %v373_v26 }
  0x9e   : > { %669 = vset.pattern.permute.xlu0 %v692_v3 }
  0x9f   : > { %521 = vrot.lane.b32.xlu0 %v670_v39, %s694_s10 }
  0xa7   : > { %557 = vrot.lane.b32.xlu0 %v671_v41, %s694_s10 }
  0xff   : > { %v494_v12 = vpop.permute.xlu0 %493 }
 0x100   : > { %v497_v13 = vadd.f32 %v496_v11, %v494_v12 }
 0x102   : > { %v499_v14 = vmul.f32 0.2, %v497_v13  ;;  %vm498_vm1 = vcmp.gt.f32.partialorder %v497_v13, 0.0 }
 0x104   : > { %v500_v16 = vsel %vm498_vm1, %v497_v13, %v499_v14 }
 0x105   : > { %v501_v17 = vadd.f32 %v500_v16, %v428_v15 }
 0x107   : > { %v502_v19 = vsel %vm442_vm2, %v501_v17, -inf }
 0x108   : > { %503 = vmax.xlane.f32.xlu1 %v502_v19  ;;  %v434_v20 = vpop.permute.xlu0 %433 }
 0x109   : > { %v437_v21 = vadd.f32 %v436_v18, %v434_v20 }
 0x10b   : > { %vm438_vm3 = vcmp.gt.f32.partialorder %v437_v21, 0.0  ;;  %v439_v22 = vmul.f32 0.2, %v437_v21 }
 0x10d   : > { %v440_v23 = vsel %vm438_vm3, %v437_v21, %v439_v22 }
 0x10e   : > { %v441_v24 = vadd.f32 %v440_v23, %v428_v15 }
 0x110   : > { %v443_v25 = vsel %vm442_vm2, %v441_v24, -inf }
 0x111   : > { %444 = vmax.xlane.f32.xlu1 %v443_v25  ;;  %v522_v50 = vpop.permute.xlu0 %521 }
 0x119   : > { %v558_v63 = vpop.permute.xlu0 %557 }
 0x17b   : > { %v504_v28 = vpop.xlane.xlu1 %503 }
 0x17c   : > { %v505_v29 = vsub.f32 %v501_v17, %v504_v28 }
 0x17e   : > { %v506_v30 = vmul.f32 1.442695, %v505_v29 }
 0x180   : > { %672 = vpow2.f32 %v506_v30 }
 0x184   : > { %v445_v31 = vpop.xlane.xlu1 %444 }
 0x185   : > { %v446_v32 = vsub.f32 %v441_v24, %v445_v31 }
 0x186   : > { %v673_v33 = vpop.eup %672 }
 0x187   : > { %v447_v34 = vmul.f32 1.442695, %v446_v32  ;;  %v508_v35 = vsel %vm442_vm2, %v673_v33, 0.0 }
 0x188   : > { %509 = vadd.xlane.f32.xlu2 %v508_v35 }
 0x189   : > { %674 = vpow2.f32 %v447_v34 }
 0x18f   : > { %v675_v36 = vpop.eup %674 }
 0x190   : > { %v449_v37 = vsel %vm442_vm2, %v675_v36, 0.0 }
 0x191   : > { %450 = vadd.xlane.f32.xlu1 %v449_v37 }
 0x1a0   : > { %665 = vrot.lane.b32.xlu2 %v664_v38, %s694_s10 }
 0x1aa   : > { %553 = vrot.lane.b32.xlu1 %v771_v5, %s694_s10 }
 0x1fb   : > { %v510_v40 = vpop.xlane.xlu2 %509 }
 0x1fc   : > { %676 = vrcp.f32 %v510_v40 }
 0x202   : > { %v677_v43 = vpop.eup %676 }
 0x203   : > { %v666_v42 = vpop.permute.xlu2 %665  ;;  %v512_v47 = vmul.f32 %v677_v43, %v673_v33 }
 0x204   : > { %v451_v44 = vpop.xlane.xlu1 %450  ;;  %v667_v45 = vunpack.i.l.bf16 %v666_v42  ;;  %v668_v46 = vunpack.i.h.bf16 %v666_v42 }
 0x205   : > { %678 = vrcp.f32 %v451_v44 }
 0x206   : > { %541 = vmatpush.msrb.mxu1 %v667_v45 }
 0x208   : > { %542 = vmatpush.msrb.mxu1 %v668_v46 }
 0x209   : > { %646 = vmatmul.msk.f32.vlgmr.msrb.gmra.mxu1 %vm442_vm2, %v512_v47 }
 0x20b   : > { %v679_v48 = vpop.eup %678 }
 0x20c   : > { %v453_v49 = vmul.f32 %v679_v48, %v675_v36 }
 0x20e   : > { %644 = vmatmul.msk.f32.vlgmr.msra.gmra.mxu3 %vm442_vm2, %v453_v49 }
 0x21c   : > { %v554_v60 = vpop.permute.xlu1 %553 }
 0x286   : > { %v544_v51 = vpop.f32.mrf.mxu1 }
 0x287   : > { %v545_v52 = vadd.f32 %v544_v51, %v522_v50 }
 0x289   : > { %v548_v53 = vmin.f32 %v545_v52, 0.0  ;;  %vm547_vm4 = vcmp.gt.f32.partialorder %v545_v52, 0.0 }
 0x28b   : > { %v549_v54 = vmul.f32 1.442695, %v548_v53 }
 0x28d   : > { %680 = vpow2.f32 %v549_v54 }
 0x291   : > { %v477_v55 = vpop.f32.mrf.mxu3 }
 0x292   : > { %v478_v56 = vadd.f32 %v670_v39, %v477_v55 }
 0x293   : > { %v681_v57 = vpop.eup %680 }
 0x294   : > { %v647_v58 = vadd.f32 -1.0, %v681_v57  ;;  %v481_v59 = vmin.f32 %v478_v56, 0.0  ;;  %vm480_vm5 = vcmp.gt.f32.partialorder %v478_v56, 0.0 }
 0x296   : > { %v482_v61 = vmul.f32 1.442695, %v481_v59  ;;  %v552_v62 = vsel %vm547_vm4, %v545_v52, %v647_v58 }
 0x297   : > { %v556_v0 = vadd.f32 %v554_v60, %v552_v62 }
 0x298   : > { %682 = vpow2.f32 %v482_v61 }
 0x299   : > { %v560_v1 = vadd.f32 %v558_v63, %v556_v0 }
 0x29b   : > { %562 = vrot.lane.b32.xlu2 %v560_v1, %s695_s15 }
 0x29e   : > { %v683_v2 = vpop.eup %682 }
 0x29f   : > { %v645_v3 = vadd.f32 -1.0, %v683_v2 }
 0x2a1   : > { %v485_v4 = vsel %vm480_vm5, %v478_v56, %v645_v3 }
 0x2a2   : > { %v486_v6 = vadd.f32 %v485_v4, %v771_v5 }
 0x2a4   : > { %v490_v7 = vadd.f32 %v671_v41, %v486_v6 }
 0x2a6   : > { %491 = vst.msk [vmem:[%s344_s19] sm:$0xff] %vm349_vm0, %v490_v7 }
 0x2f5   : > { %v563_v8 = vpop.permute.xlu2 %562 }
 0x2f6   : > { %566 = vst.msk [vmem:[%s344_s19] sm:$0xff] %vm565_vm6, %v563_v8 }
 0x2f7 PF: > { %s19_s30 = sadd.s32 1, %s690_s30  }
 0x2f8   : > { %p16_p4 = scmp.ge.s32.totalorder %s19_s30, 4  }
 0x2fa   :  { %18 = sbr.rel (!%p16_p4) target bundleno = 1 (0x1), region = 89 }

// kernel: deep_gat_forward.5
= control target key start
LH: loop header
LB: loop body
LE: loop exit
PB: predicated region body
PF: predicated region fallthrough
CT: control target
= control target key end

     0   :  { %s749_s30 = smov 0   ;;  %s823_s0 = inlined_call_operand.vmem [shape: f32[16,16], index: 0, kind: input, shape index: {}, may-alias: {0,1}]   ;;  %s824_s1 = inlined_call_operand.vmem [shape: f32[16,16], index: 1, kind: input, shape index: {}, may-alias: {0,1}]   ;;  %s825_s2 = inlined_call_operand.vmem [shape: f32[16,16], index: 2, kind: input, shape index: {}]   ;;  %s826_s3 = inlined_call_operand.vmem [shape: f32[16,16], index: 3, kind: input, shape index: {}]   ;;  %s827_s4 = inlined_call_operand.vmem [shape: f32[16,18], index: 4, kind: input, shape index: {}]   ;;  %s828_s5 = inlined_call_operand.vmem [shape: f32[2,16], index: 5, kind: input, shape index: {}]   ;;  %s829_s6 = inlined_call_operand.vmem [shape: f32[1,16], index: 6, kind: input, shape index: {}]   ;;  %s830_s7 = inlined_call_operand.vmem [shape: f32[1,16], index: 7, kind: input, shape index: {}]   ;;  %s831_s8 = inlined_call_operand.vmem [shape: f32[16,16], index: 8, kind: input, shape index: {}]   ;;  %s832_s9 = inlined_call_operand.vmem [shape: f32[16,16], index: 9, kind: output, shape index: {}]  }
   0x1 LB: > { %s635_s10 = sadd.s32 4294967295, %s693_s30   ;;  %p639_p0 = scmp.ge.s32.totalorder %s693_s30, 1  ;;  %s693_s30 = sphi %s749_s30, %s19_s30  }
   0x2   : > { %p295_p1 = scmp.lt.s32.totalorder %s693_s30, 3 }
   0x4   : > { %p296_p2 = pnand %p639_p0, %p295_p1 }
   0x5   : > { %p333_p3 = scmp.lt.s32.totalorder (!%p296_p2), %s635_s10, 1  ;;  %s697_s16 = smov (!%p296_p2), 120  }
   0x6   : > { %299 = sbr.rel (%p296_p2) target bundleno = 759 (0x2f7), region = 56  ;;  %s698_s22 = smov (!%p296_p2), 8  }
   0xb   : > { %v381_v0 = vld [vmem:[%s827_s4 + $0x8] sm:$0xff]  ;;  %v380_v1 = vld [vmem:[%s827_s4] sm:$0xff]  ;;  %s834_s10 = smov (!%p333_p3, %s635_s10), 1  ;;  %v695_v5 = vmov 17   ;;  %vm350_vm0 = vcmask 130048   ;;  %v696_v8 = vmov 16  }
   0xc   : > { %v407_v2 = vld [vmem:[%s825_s2 + $0x8] sm:$0xff]  ;;  %399 = vmatpush.msra.mxu1 %v381_v0  ;;  %v406_v3 = vld [vmem:[%s825_s2] sm:$0xff]  ;;  %665 = vset.pattern.permute.xlu0 %v695_v5  ;;  %s772_s21 = sshll.u32 %s834_s10, 3  ;;  %vm493_vm5 = vcmask 64512   ;;  %vm568_vm6 = vcmask 130112  }
   0xd   : > { %425 = vmatpush.msra.mxu2 %v407_v2  ;;  %v405_v4 = vld [vmem:[%s828_s5] sm:$0x3]  ;;  %s336_s24 = scalar_lea.vmem %s823_s0, %s772_s21  ;;  %v349_v9 = vld [vmem:[%s826_s3 + $0x8] sm:$0xff]  ;;  %s340_s15 = scalar_lea.vmem %s831_s8, %s772_s21 }
   0xe   : > { %400 = vmatpush.msra.mxu1 %v380_v1  ;;  %v345_v6 = vld [vmem:[%s336_s24] sm:$0xff]  ;;  %371 = vmatpush.msra.mxu0 %v349_v9  ;;  %v347_v13 = vld [vmem:[%s824_s1 + $0x8] sm:$0xff]  ;;  %s344_s25 = scalar_lea.vmem %s832_s9, %s772_s21 }
   0xf   : > { %426 = vmatpush.msra.mxu2 %v406_v3  ;;  %645 = vmatmul.msk.f32.vlgmr.msra.gmra.mxu1 %vm350_vm0, %v345_v6  ;;  %v348_v10 = vld [vmem:[%s826_s3] sm:$0xff] }
  0x10   : > { %646 = vmatmul.msk.f32.vlgmr.msra.gmra.mxu2 %vm350_vm0, %v405_v4  ;;  %v346_v11 = vld [vmem:[%s824_s1] sm:$0xff]  ;;  %372 = vmatpush.msra.mxu0 %v348_v10 }
  0x11   : > { %643 = vmatmul.msk.f32.vlgmr.msra.gmra.mxu0 %vm350_vm0, %v346_v11  ;;  %v431_v18 = vld [vmem:[%s340_s15] sm:$0xff] }
  0x12   : > { %v673_v42 = vld [vmem:[%s829_s6] ss:$0 sm:$0xff] }
  0x13   : > { %v674_v44 = vld [vmem:[%s830_s7] ss:$0 sm:$0xff] }
  0x19   : > { %644 = vmatmul.msk.f32.gmra.mxu0 %vm350_vm0, %v347_v13 }
  0x8c   : > { %v780_v7 = vpop.f32.mrf.mxu1 }
  0x8d   : > { %496 = vperm.xlu0 %665, %v780_v7  }
  0x8e   : > { %v374_v29 = vpop.f32.mrf.mxu0 }
  0x93   : > { %v428_v12 = vpop.f32.mrf.mxu2 }
  0x94   : > { %v499_v14 = vperm.slane %v428_v12, 1  ;;  %v439_v21 = vperm.slane %v428_v12, 0 }
  0x95   : > { %666 = vset.pattern.permute.xlu0 %v696_v8 }
  0x96   : > { %436 = vperm.xlu0 %666, %v780_v7   ;;  %v377_v30 = vpop.f32.mrf.mxu0 }
  0x97   : > { %476 = vmatpush.msra.mxu3 %v377_v30  ;;  %v667_v41 = vpack.i.bf16 %v374_v29, %v377_v30 }
  0x99   : > { %477 = vmatpush.msra.mxu3 %v374_v29 }
  0x9e   : > { %672 = vset.pattern.permute.xlu0 %v695_v5 }
  0x9f   : > { %524 = vrot.lane.b32.xlu0 %v673_v42, %s697_s16 }
  0xa7   : > { %560 = vrot.lane.b32.xlu0 %v674_v44, %s697_s16 }
  0xff   : > { %v497_v15 = vpop.permute.xlu0 %496 }
 0x100   : > { %v500_v16 = vadd.f32 %v499_v14, %v497_v15 }
 0x102   : > { %v502_v17 = vmul.f32 0.2, %v500_v16  ;;  %vm501_vm1 = vcmp.gt.f32.partialorder %v500_v16, 0.0 }
 0x104   : > { %v503_v19 = vsel %vm501_vm1, %v500_v16, %v502_v17 }
 0x105   : > { %v504_v20 = vadd.f32 %v503_v19, %v431_v18 }
 0x107   : > { %v505_v22 = vsel %vm350_vm0, %v504_v20, -inf }
 0x108   : > { %506 = vmax.xlane.f32.xlu1 %v505_v22  ;;  %v437_v23 = vpop.permute.xlu0 %436 }
 0x109   : > { %v440_v24 = vadd.f32 %v439_v21, %v437_v23 }
 0x10b   : > { %vm441_vm2 = vcmp.gt.f32.partialorder %v440_v24, 0.0  ;;  %v442_v25 = vmul.f32 0.2, %v440_v24 }
 0x10d   : > { %v443_v26 = vsel %vm441_vm2, %v440_v24, %v442_v25 }
 0x10e   : > { %v444_v27 = vadd.f32 %v443_v26, %v431_v18 }
 0x110   : > { %v445_v28 = vsel %vm350_vm0, %v444_v27, -inf }
 0x111   : > { %446 = vmax.xlane.f32.xlu1 %v445_v28  ;;  %v525_v53 = vpop.permute.xlu0 %524 }
 0x119   : > { %v561_v2 = vpop.permute.xlu0 %560 }
 0x17b   : > { %v507_v31 = vpop.xlane.xlu1 %506 }
 0x17c   : > { %v508_v32 = vsub.f32 %v504_v20, %v507_v31 }
 0x17e   : > { %v509_v33 = vmul.f32 1.442695, %v508_v32 }
 0x180   : > { %675 = vpow2.f32 %v509_v33 }
 0x184   : > { %v447_v34 = vpop.xlane.xlu1 %446 }
 0x185   : > { %v448_v35 = vsub.f32 %v444_v27, %v447_v34 }
 0x186   : > { %v676_v36 = vpop.eup %675 }
 0x187   : > { %v449_v37 = vmul.f32 1.442695, %v448_v35  ;;  %v511_v38 = vsel %vm350_vm0, %v676_v36, 0.0 }
 0x188   : > { %512 = vadd.xlane.f32.xlu2 %v511_v38 }
 0x189   : > { %677 = vpow2.f32 %v449_v37 }
 0x18f   : > { %v678_v39 = vpop.eup %677 }
 0x190   : > { %v451_v40 = vsel %vm350_vm0, %v678_v39, 0.0 }
 0x191   : > { %452 = vadd.xlane.f32.xlu1 %v451_v40 }
 0x1a0   : > { %668 = vrot.lane.b32.xlu2 %v667_v41, %s697_s16 }
 0x1aa   : > { %556 = vrot.lane.b32.xlu1 %v780_v7, %s697_s16 }
 0x1fb   : > { %v513_v43 = vpop.xlane.xlu2 %512 }
 0x1fc   : > { %679 = vrcp.f32 %v513_v43 }
 0x202   : > { %v680_v46 = vpop.eup %679 }
 0x203   : > { %v669_v45 = vpop.permute.xlu2 %668  ;;  %v515_v50 = vmul.f32 %v680_v46, %v676_v36 }
 0x204   : > { %v453_v47 = vpop.xlane.xlu1 %452  ;;  %v670_v48 = vunpack.i.l.bf16 %v669_v45  ;;  %v671_v49 = vunpack.i.h.bf16 %v669_v45 }
 0x205   : > { %681 = vrcp.f32 %v453_v47 }
 0x206   : > { %544 = vmatpush.msrb.mxu1 %v670_v48 }
 0x208   : > { %545 = vmatpush.msrb.mxu1 %v671_v49 }
 0x209   : > { %649 = vmatmul.msk.f32.vlgmr.msrb.gmra.mxu1 %vm350_vm0, %v515_v50 }
 0x20b   : > { %v682_v51 = vpop.eup %681 }
 0x20c   : > { %v455_v52 = vmul.f32 %v682_v51, %v678_v39 }
 0x20e   : > { %647 = vmatmul.msk.f32.vlgmr.msra.gmra.mxu3 %vm350_vm0, %v455_v52 }
 0x21c   : > { %v557_v63 = vpop.permute.xlu1 %556 }
 0x286   : > { %v547_v54 = vpop.f32.mrf.mxu1 }
 0x287   : > { %v548_v55 = vadd.f32 %v547_v54, %v525_v53 }
 0x289   : > { %v551_v56 = vmin.f32 %v548_v55, 0.0  ;;  %vm550_vm3 = vcmp.gt.f32.partialorder %v548_v55, 0.0 }
 0x28b   : > { %v552_v57 = vmul.f32 1.442695, %v551_v56 }
 0x28d   : > { %683 = vpow2.f32 %v552_v57 }
 0x291   : > { %v479_v58 = vpop.f32.mrf.mxu3 }
 0x292   : > { %v480_v59 = vadd.f32 %v673_v42, %v479_v58 }
 0x293   : > { %v684_v60 = vpop.eup %683 }
 0x294   : > { %v650_v61 = vadd.f32 -1.0, %v684_v60  ;;  %v483_v62 = vmin.f32 %v480_v59, 0.0  ;;  %vm482_vm4 = vcmp.gt.f32.partialorder %v480_v59, 0.0 }
 0x296   : > { %v484_v0 = vmul.f32 1.442695, %v483_v62  ;;  %v555_v1 = vsel %vm550_vm3, %v548_v55, %v650_v61 }
 0x297   : > { %v559_v3 = vadd.f32 %v557_v63, %v555_v1 }
 0x298   : > { %685 = vpow2.f32 %v484_v0 }
 0x299   : > { %v563_v4 = vadd.f32 %v561_v2, %v559_v3 }
 0x29b   : > { %565 = vrot.lane.b32.xlu2 %v563_v4, %s698_s22 }
 0x29e   : > { %v686_v5 = vpop.eup %685 }
 0x29f   : > { %v648_v6 = vadd.f32 -1.0, %v686_v5 }
 0x2a1   : > { %v487_v8 = vsel %vm482_vm4, %v480_v59, %v648_v6 }
 0x2a2   : > { %v488_v9 = vadd.f32 %v487_v8, %v780_v7 }
 0x2a4   : > { %v492_v10 = vadd.f32 %v674_v44, %v488_v9 }
 0x2a6   : > { %494 = vst.msk [vmem:[%s344_s25] sm:$0xff] %vm493_vm5, %v492_v10 }
 0x2f5   : > { %v566_v11 = vpop.permute.xlu2 %565 }
 0x2f6   : > { %569 = vst.msk [vmem:[%s344_s25] sm:$0xff] %vm568_vm6, %v566_v11 }
 0x2f7 PF: > { %s19_s30 = sadd.s32 1, %s693_s30  }
 0x2f8   : > { %p16_p4 = scmp.ge.s32.totalorder %s19_s30, 4  }
 0x2fa   :  { %18 = sbr.rel (!%p16_p4) target bundleno = 1 (0x1), region = 89 }

// kernel: deep_gat_forward.6
= control target key start
LH: loop header
LB: loop body
LE: loop exit
PB: predicated region body
PF: predicated region fallthrough
CT: control target
= control target key end

     0   :  { %s644_s30 = smov 0   ;;  %s709_s0 = inlined_call_operand.vmem [shape: f32[16,16], index: 0, kind: input, shape index: {}, may-alias: {0,1}]   ;;  %s710_s1 = inlined_call_operand.vmem [shape: f32[16,16], index: 1, kind: input, shape index: {}, may-alias: {0,1}]   ;;  %s711_s2 = inlined_call_operand.vmem [shape: f32[16,16], index: 2, kind: input, shape index: {}]   ;;  %s712_s3 = inlined_call_operand.vmem [shape: f32[16,8], index: 3, kind: input, shape index: {}]   ;;  %s713_s4 = inlined_call_operand.vmem [shape: f32[16,9], index: 4, kind: input, shape index: {}]   ;;  %s714_s5 = inlined_call_operand.vmem [shape: f32[1,16], index: 5, kind: input, shape index: {}]   ;;  %s715_s6 = inlined_call_operand.vmem [shape: f32[1,8], index: 6, kind: input, shape index: {}]   ;;  %s716_s7 = inlined_call_operand.vmem [shape: f32[1,8], index: 7, kind: input, shape index: {}]   ;;  %s717_s8 = inlined_call_operand.vmem [shape: f32[16,16], index: 8, kind: input, shape index: {}]   ;;  %s718_s9 = inlined_call_operand.vmem [shape: f32[16,8], index: 9, kind: output, shape index: {}]  }
   0x1 LB: > { %s554_s10 = sadd.s32 4294967295, %s591_s30   ;;  %p558_p0 = scmp.ge.s32.totalorder %s591_s30, 1  ;;  %s591_s30 = sphi %s644_s30, %s19_s30  }
   0x2   : > { %p295_p1 = scmp.lt.s32.totalorder %s591_s30, 3 }
   0x4   : > { %p296_p2 = pnand %p558_p0, %p295_p1 }
   0x5   : > { %p333_p3 = scmp.lt.s32.totalorder (!%p296_p2), %s554_s10, 1 }
   0x6   : > { %299 = sbr.rel (%p296_p2) target bundleno = 656 (0x290), region = 56 }
   0xb   : > { %v381_v0 = vld [vmem:[%s713_s4 + $0x8] sm:$0xff]  ;;  %v380_v1 = vld [vmem:[%s713_s4] sm:$0xff]  ;;  %s720_s10 = smov (!%p333_p3, %s554_s10), 1  ;;  %v593_v5 = vmov 8   ;;  %vm350_vm0 = vcmask 130048   ;;  %vm487_vm2 = vcmask 64512  }
   0xc   : > { %v407_v2 = vld [vmem:[%s711_s2 + $0x8] sm:$0xff]  ;;  %399 = vmatpush.msra.mxu1 %v381_v0  ;;  %v406_v3 = vld [vmem:[%s711_s2] sm:$0xff]  ;;  %578 = vset.pattern.permute.xlu0 %v593_v5  ;;  %s667_s21 = sshll.u32 %s720_s10, 3 }
   0xd   : > { %425 = vmatpush.msra.mxu2 %v407_v2  ;;  %v405_v4 = vld [vmem:[%s714_s5] sm:$0x1]  ;;  %s336_s24 = scalar_lea.vmem %s709_s0, %s667_s21  ;;  %v349_v8 = vld [vmem:[%s712_s3 + $0x8] sm:$0xff]  ;;  %s340_s15 = scalar_lea.vmem %s717_s8, %s667_s21 }
   0xe   : > { %400 = vmatpush.msra.mxu1 %v380_v1  ;;  %v345_v6 = vld [vmem:[%s336_s24] sm:$0xff]  ;;  %371 = vmatpush.msra.mxu0 %v349_v8  ;;  %v347_v11 = vld [vmem:[%s710_s1 + $0x8] sm:$0xff]  ;;  %s344_s23 = scalar_lea.vmem %s718_s9, %s667_s21 }
   0xf   : > { %426 = vmatpush.msra.mxu2 %v406_v3  ;;  %564 = vmatmul.msk.f32.vlgmr.msra.gmra.mxu1 %vm350_vm0, %v345_v6  ;;  %v348_v9 = vld [vmem:[%s712_s3] sm:$0xff] }
  0x10   : > { %565 = vmatmul.msk.f32.vlgmr.msra.gmra.mxu2 %vm350_vm0, %v405_v4  ;;  %v346_v10 = vld [vmem:[%s710_s1] sm:$0xff]  ;;  %372 = vmatpush.msra.mxu0 %v348_v9 }
  0x11   : > { %562 = vmatmul.msk.f32.vlgmr.msra.gmra.mxu0 %vm350_vm0, %v346_v10  ;;  %v431_v17 = vld [vmem:[%s340_s15] sm:$0xff] }
  0x12   : > { %v579_v31 = vld [vmem:[%s715_s6] ss:$0 sm:$0xff] }
  0x13   : > { %v580_v34 = vld [vmem:[%s716_s7] ss:$0 sm:$0xff] }
  0x19   : > { %563 = vmatmul.msk.f32.gmra.mxu0 %vm350_vm0, %v347_v11 }
  0x8c   : > { %v402_v7 = vpop.f32.mrf.mxu1 }
  0x8d   : > { %436 = vperm.xlu0 %578, %v402_v7  }
  0x8e   : > { %v374_v21 = vpop.f32.mrf.mxu0 }
  0x93   : > { %v428_v12 = vpop.f32.mrf.mxu2 }
  0x94   : > { %v439_v13 = vperm.slane %v428_v12, 0 }
  0x96   : > { %v377_v22 = vpop.f32.mrf.mxu0 }
  0x97   : > { %476 = vmatpush.msra.mxu3 %v377_v22 }
  0x99   : > { %477 = vmatpush.msra.mxu3 %v374_v21 }
  0xff   : > { %v437_v14 = vpop.permute.xlu0 %436 }
 0x100   : > { %v440_v15 = vadd.f32 %v439_v13, %v437_v14 }
 0x102   : > { %vm441_vm1 = vcmp.gt.f32.partialorder %v440_v15, 0.0  ;;  %v442_v16 = vmul.f32 0.2, %v440_v15 }
 0x104   : > { %v443_v18 = vsel %vm441_vm1, %v440_v15, %v442_v16 }
 0x105   : > { %v444_v19 = vadd.f32 %v443_v18, %v431_v17 }
 0x107   : > { %v445_v20 = vsel %vm350_vm0, %v444_v19, -inf }
 0x108   : > { %446 = vmax.xlane.f32.xlu0 %v445_v20 }
 0x17b   : > { %v447_v23 = vpop.xlane.xlu0 %446 }
 0x17c   : > { %v448_v24 = vsub.f32 %v444_v19, %v447_v23 }
 0x17e   : > { %v449_v25 = vmul.f32 1.442695, %v448_v24 }
 0x180   : > { %581 = vpow2.f32 %v449_v25 }
 0x186   : > { %v582_v26 = vpop.eup %581 }
 0x187   : > { %v451_v27 = vsel %vm350_vm0, %v582_v26, 0.0 }
 0x188   : > { %452 = vadd.xlane.f32.xlu1 %v451_v27 }
 0x1fb   : > { %v453_v28 = vpop.xlane.xlu1 %452 }
 0x1fc   : > { %583 = vrcp.f32 %v453_v28 }
 0x202   : > { %v584_v29 = vpop.eup %583 }
 0x203   : > { %v455_v30 = vmul.f32 %v584_v29, %v582_v26 }
 0x205   : > { %566 = vmatmul.msk.f32.vlgmr.msra.gmra.mxu3 %vm350_vm0, %v455_v30 }
 0x288   : > { %v479_v32 = vpop.f32.mrf.mxu3 }
 0x289   : > { %v480_v33 = vadd.f32 %v579_v31, %v479_v32 }
 0x28b   : > { %v482_v35 = vadd.f32 %v480_v33, %v402_v7 }
 0x28d   : > { %v486_v36 = vadd.f32 %v580_v34, %v482_v35 }
 0x28f   : > { %488 = vst.msk [vmem:[%s344_s23] sm:$0xff] %vm487_vm2, %v486_v36 }
 0x290 PF: > { %s19_s30 = sadd.s32 1, %s591_s30  }
 0x291   : > { %p16_p4 = scmp.ge.s32.totalorder %s19_s30, 4  }
 0x293   :  { %18 = sbr.rel (!%p16_p4) target bundleno = 1 (0x1), region = 89 }

// kernel: deep_gat_forward.7
= control target key start
LH: loop header
LB: loop body
LE: loop exit
PB: predicated region body
PF: predicated region fallthrough
CT: control target
= control target key end

     0   :  { %vm32_vm0 = vcmask 64512   ;;  %vm113_vm1 = vcmask 7168   ;;  %s191_s3 = inlined_call_operand.vmem [shape: f32[8,8], index: 3, kind: input, shape index: {}]   ;;  %s192_s2 = inlined_call_operand.vmem [shape: f32[8,8], index: 2, kind: input, shape index: {}]   ;;  %s193_s1 = inlined_call_operand.vmem [shape: f32[8,8], index: 1, kind: input, shape index: {}]   ;;  %s194_s0 = inlined_call_operand.vmem [shape: f32[8,8], index: 0, kind: input, shape index: {}]   ;;  %s195_s4 = inlined_call_operand.vmem [shape: f32[1,8], index: 4, kind: input, shape index: {}]   ;;  %s196_s5 = inlined_call_operand.vmem [shape: f32[8,1], index: 5, kind: input, shape index: {}]   ;;  %s197_s6 = inlined_call_operand.<no memory space> [shape: f32[1,1], index: 6, kind: input, shape index: {}]   ;;  %s198_s7 = inlined_call_operand.vmem [shape: f32[8,1], index: 7, kind: output, shape index: {}]  }
   0x1   :  { %v31_v0 = vld [vmem:[%s191_s3] sm:$0xff]  ;;  %v12_v5 = vstv %s197_s6 }
   0x2   :  { %v29_v1 = vld [vmem:[%s192_s2] sm:$0xff]  ;;  %51 = vmatpush.msra.mxu0 %v31_v0  ;;  %13 = vst [vmem:[#allocation2] sm:$0x1] %v12_v5 }
   0x3   :  { %v30_v2 = vld [vmem:[%s193_s1] sm:$0xff]  ;;  %74 = vmatpush.msra.mxu1 %v29_v1 }
   0x4   :  { %v28_v3 = vld [vmem:[%s194_s0] sm:$0xff]  ;;  %119 = vmatmul.msk.f32.vlgmr.msra.gmra.mxu0 %vm32_vm0, %v30_v2 }
   0x5   :  { %120 = vmatmul.msk.f32.vlgmr.msra.gmra.mxu1 %vm32_vm0, %v28_v3  ;;  %v85_v4 = vld [vmem:[%s196_s5] sm:$0xff] }
   0x6   :  { %108 = vmatpush.msra.mxu2 %v85_v4  ;;  %v122_v6 = vld [vmem:[%s195_s4] ss:$0 sm:$0xff] }
   0x9   :  { %v123_v12 = vld [vmem:[#allocation2] ss:$0 sm:$0xff] }
  0x81   :  { %v53_v7 = vpop.f32.mrf.mxu0 }
  0x82   :  { %v76_v8 = vpop.f32.mrf.mxu1 }
  0x83   :  { %v77_v9 = vadd.f32 %v76_v8, %v53_v7 }
  0x85   :  { %v83_v10 = vadd.f32 %v122_v6, %v77_v9 }
  0x87   :  { %v84_v11 = vmax.f32 %v83_v10, 0.0 }
  0x89   :  { %121 = vmatmul.msk.f32.vlgmr.msra.gmra.mxu2 %vm32_vm0, %v84_v11 }
 0x10c   :  { %v110_v13 = vpop.f32.mrf.mxu2 }
 0x10d   :  { %v111_v14 = vadd.f32 %v123_v12, %v110_v13 }
 0x10f   :  { %114 = vst.msk [vmem:[%s198_s7] sm:$0xff] %vm113_vm1, %v111_v14 }

</bundles_post_ra>
